<compile_context>
chip_gen: v7x
topology: tpu7x:2x2x1
jax: 0.10.0
libtpu: 0.0.40
codegen_flags: <defaults>
</compile_context>

<pallas_src>
import math
from functools import partial

import numpy as np
import jax
import jax.numpy as jnp
from jax import lax
from jax.experimental import pallas as pl
from jax.experimental.pallas import tpu as pltpu

_EPS = 1e-5  # PyTorch nn.LayerNorm default


# ---------------------------------------------------------------------------
# Kernel helpers
# ---------------------------------------------------------------------------
def _ln_affine(x, gamma, beta, eps=_EPS):
    """One-pass LayerNorm over the last axis; gamma/beta are (1, N) rows."""
    mu = jnp.mean(x, axis=-1, keepdims=True)
    msq = jnp.mean(x * x, axis=-1, keepdims=True)
    var = msq - mu * mu
    return (x - mu) * lax.rsqrt(var + eps) * gamma + beta


def _channel_sum(hw, width, s2):
    """Sum the `width` channel blocks of a (TB, width*S2) value -> (TB, S2).

    Log-tree fold along the lane axis (VPU adds + cheap static lane slices),
    with a linear tail for non-power-of-two widths.
    """
    acc = hw
    w_cur = width
    while w_cur > 1 and w_cur % 2 == 0:
        half = (w_cur // 2) * s2
        acc = acc[:, :half] + acc[:, half:]
        w_cur //= 2
    out = acc[:, :s2]
    for c in range(1, w_cur):
        out = out + acc[:, c * s2:(c + 1) * s2]
    return out


def _ln1_stats(x, w1_mean, w1_sq_mean, eps=_EPS):
    """bn1 statistics of conv1(x) computed from 16-lane stats of x.

    conv1 output h[c,p] = w1[c]*x[p], so
      mu1  = mean(w1) * mean(x),   E[h^2] = mean(w1^2) * mean(x^2).
    """
    mu_x = jnp.mean(x, axis=-1, keepdims=True)
    msq_x = jnp.mean(x * x, axis=-1, keepdims=True)
    mu1 = w1_mean * mu_x
    var1 = w1_sq_mean * msq_x - mu1 * mu1
    rs1 = lax.rsqrt(var1 + eps)
    return mu1, rs1


# ---------------------------------------------------------------------------
# Kernels
# ---------------------------------------------------------------------------
def _adapter_kernel_conv3x(x_ref, ma_ref, gm_ref, bm_ref, g2w3_ref, cb2_ref,
                           g3_ref, b3_ref, out_ref, *, width, s2,
                           w1_mean, w1_sq_mean):
    x = x_ref[...]                                   # (TB, S2) f32 padded image rows

    # conv1 + bn1 folded into the dense 3x3 operator:
    #   z = bn1(conv1(x)) @ M = rs1*(x @ M_A) - (mu1*rs1)*(g1@M) + (b1@M)
    # The only MXU matmul: K = S2 = 16, f32 operands, f32 accumulation.
    mu1, rs1 = _ln1_stats(x, w1_mean, w1_sq_mean)
    xm = jnp.dot(x, ma_ref[...], preferred_element_type=jnp.float32)   # (TB, C*S2)
    z = rs1 * xm - (mu1 * rs1) * gm_ref[...] + bm_ref[...]

    # bn2 (one-pass stats) with conv3's w3 folded into its affine params:
    #   y = sum_c w3[c]*bn2(z)[c,:] = channel_sum(t * (w3*g2)) + sum_c w3[c]*b2[c,:]
    mu2 = jnp.mean(z, axis=-1, keepdims=True)
    var2 = jnp.mean(z * z, axis=-1, keepdims=True) - mu2 * mu2
    t = (z - mu2) * lax.rsqrt(var2 + _EPS)
    y = _channel_sum(t * g2w3_ref[...], width, s2) + cb2_ref[...]      # (TB, S2)

    # bn3 + residual; lane-dense (TB, S2) store, c_in slice happens in XLA.
    out = _ln_affine(y, g3_ref[...], b3_ref[...])
    out_ref[...] = (out + x).astype(out_ref.dtype)


def _adapter_kernel_conv1x(x_ref, a_ref, brow_ref, crow_ref, g3_ref, b3_ref,
                           out_ref, *, w1_mean, w1_sq_mean):
    x = x_ref[...]                                   # (TB, S2)
    # conv1 -> bn1 -> conv3 collapsed to: y = rs1*(x.*A) - (mu1*rs1)*B + C
    mu1, rs1 = _ln1_stats(x, w1_mean, w1_sq_mean)
    y = rs1 * (x * a_ref[...]) - (mu1 * rs1) * brow_ref[...] + crow_ref[...]
    out = _ln_affine(y, g3_ref[...], b3_ref[...])    # bn3
    out_ref[...] = (out + x).astype(out_ref.dtype)   # residual


# ---------------------------------------------------------------------------
# Wrapper (pallas_call + BlockSpecs)
# ---------------------------------------------------------------------------
def _default_batch_tile():
    """Per-generation default (review feedback):
    v7x: 64  -> >=2 grid steps per TensorCore at BATCH=256 so the BlockSpec
               pipeline can hide the x/out DMAs and the weight prologue.
    v6e: 256 -> single TC; one fat M=256 step halves per-step overhead.
    v5e / unknown: 128 -> matches the 128-row MXUs."""
    try:
        kind = jax.devices()[0].device_kind.lower()
    except Exception:
        kind = ""
    if "v7" in kind or "7x" in kind:
        return 64
    if "v6" in kind:
        return 256
    return 128


def adapter_forward(x, kparams, *, c_in, c_type, width=16, batch_tile=None):
    """x: (B, c_in) float32. Returns (B, c_in)."""
    size = int(math.ceil(math.sqrt(c_in)))
    s2 = size * size
    cs2 = width * s2
    b = x.shape[0]

    if batch_tile is None:
        batch_tile = _default_batch_tile()
    # Don't over-pad tiny batches; keep the sublane multiple of 8.
    batch_tile = min(batch_tile, 8 * pl.cdiv(b, 8))

    # Glue (plain XLA): pad features to the square image, pad batch to a tile
    # multiple (padded rows are computed and then dropped).
    b_pad = batch_tile * pl.cdiv(b, batch_tile)
    x_pad = jnp.pad(x, ((0, b_pad - b), (0, s2 - c_in)))

    const = lambda i: (0, 0)
    row_cs2 = pl.BlockSpec((1, cs2), const)
    row_s2 = pl.BlockSpec((1, s2), const)
    x_spec = pl.BlockSpec((batch_tile, s2), lambda i: (i, 0))
    out_spec = pl.BlockSpec((batch_tile, s2), lambda i: (i, 0))

    if c_type == 'conv-3x':
        kernel = partial(_adapter_kernel_conv3x, width=width, s2=s2,
                         w1_mean=kparams['w1_mean'],
                         w1_sq_mean=kparams['w1_sq_mean'])
        in_arrays = [x_pad, kparams['m_a'], kparams['gm'], kparams['bm'],
                     kparams['g2w3'], kparams['cb2'],
                     kparams['g3'], kparams['b3']]
        in_specs = [x_spec,
                    pl.BlockSpec((s2, cs2), const),   # folded dense operator (f32)
                    row_cs2, row_cs2, row_cs2,
                    row_s2, row_s2, row_s2]
    else:  # 'conv-1x'
        kernel = partial(_adapter_kernel_conv1x,
                         w1_mean=kparams['w1_mean'],
                         w1_sq_mean=kparams['w1_sq_mean'])
        in_arrays = [x_pad, kparams['a1x'], kparams['b1x'], kparams['c1x'],
                     kparams['g3'], kparams['b3']]
        in_specs = [x_spec, row_s2, row_s2, row_s2, row_s2, row_s2]

    out_padded = pl.pallas_call(
        kernel,
        out_shape=jax.ShapeDtypeStruct((b_pad, s2), x.dtype),
        grid=(b_pad // batch_tile,),
        in_specs=in_specs,
        out_specs=out_spec,
        compiler_params=pltpu.CompilerParams(
            dimension_semantics=("parallel",)),
    )(*in_arrays)

    # Lane-dense store inside the kernel; c_in slice + batch un-pad out here.
    return out_padded[:b, :c_in]


# ---------------------------------------------------------------------------
# Parameter init (deterministic, PyTorch shapes) + folding into kernel form
# ---------------------------------------------------------------------------
def init_adapter_params(key, c_in, width=16):
    size = int(math.ceil(math.sqrt(c_in)))
    ks = jax.random.split(key, 8)
    w1 = jax.random.normal(ks[0], (width, 1, 1, 1), jnp.float32) * 0.5
    w2 = jax.random.normal(ks[1], (width, width, 3, 3), jnp.float32) * (1.0 / math.sqrt(width * 9))
    w3 = jax.random.normal(ks[2], (1, width, 1, 1), jnp.float32) * (1.0 / math.sqrt(width))
    g1 = 1.0 + 0.1 * jax.random.normal(ks[3], (width, size, size), jnp.float32)
    b1 = 0.1 * jax.random.normal(ks[4], (width, size, size), jnp.float32)
    g2 = 1.0 + 0.1 * jax.random.normal(ks[5], (width, size, size), jnp.float32)
    b2 = 0.1 * jax.random.normal(ks[6], (width, size, size), jnp.float32)
    g3 = 1.0 + 0.1 * jax.random.normal(ks[7], (1, size, size), jnp.float32)
    b3 = jnp.zeros((1, size, size), jnp.float32)
    return dict(w1=w1, w2=w2, w3=w3, g1=g1, b1=b1, g2=g2, b2=b2, g3=g3, b3=b3)


def _conv3x3_to_dense(w2, h, w):
    """Dense operator M (Cin*H*W, Cout*H*W) s.t. out_flat = in_flat @ M (CHW order, zero pad=1)."""
    cout, cin, kh_max, kw_max = w2.shape
    s2 = h * w
    m = np.zeros((cin * s2, cout * s2), dtype=np.float32)
    for co in range(cout):
        for ci in range(cin):
            for ho in range(h):
                for wo in range(w):
                    for kh in range(kh_max):
                        for kw in range(kw_max):
                            hi = ho + kh - 1
                            wi = wo + kw - 1
                            if 0 <= hi < h and 0 <= wi < w:
                                m[ci * s2 + hi * w + wi, co * s2 + ho * w + wo] += w2[co, ci, kh, kw]
    return m


def fold_params_for_kernel(p, c_in, width=16):
    """Fold the PyTorch-shaped parameters into the constant rows/operators the
    kernels consume (all algebraically exact, done once on the host)."""
    size = int(math.ceil(math.sqrt(c_in)))
    s2 = size * size

    w1 = np.asarray(p['w1']).reshape(width)            # conv1 (width,1,1,1)
    w3 = np.asarray(p['w3']).reshape(width)            # conv3 (1,width,1,1)
    g1 = np.asarray(p['g1']).reshape(width, s2)
    b1 = np.asarray(p['b1']).reshape(width, s2)
    g2 = np.asarray(p['g2']).reshape(width, s2)
    b2 = np.asarray(p['b2']).reshape(width, s2)
    g3 = np.asarray(p['g3']).reshape(1, s2)
    b3 = np.asarray(p['b3']).reshape(1, s2)

    # bn1 statistics of conv1(x) need only these two scalars (static kernel consts).
    w1_mean = float(w1.mean())
    w1_sq_mean = float((w1 * w1).mean())

    # conv-1x collapse:  y = rs1*(x.*A) - (mu1*rs1)*B + C
    a1x = (w3[:, None] * w1[:, None] * g1).sum(0).reshape(1, s2)
    b1x = (w3[:, None] * g1).sum(0).reshape(1, s2)
    c1x = (w3[:, None] * b1).sum(0).reshape(1, s2)

    # conv-3x: fold conv1+bn1 into the dense 3x3 operator (K: 256 -> 16, f32).
    m = _conv3x3_to_dense(np.asarray(p['w2']), size, size)          # (C*S2, C*S2)
    m3 = m.reshape(width, s2, width * s2)                           # (c, p, j)
    m_a = np.einsum('cp,cpj->pj', w1[:, None] * g1, m3)             # (S2, C*S2)
    gm = (g1.reshape(-1) @ m).reshape(1, width * s2)                # g1 @ M
    bm = (b1.reshape(-1) @ m).reshape(1, width * s2)                # b1 @ M

    # conv3's w3 folded into bn2's affine: g2w3 row + cb2 constant row.
    g2w3 = (w3[:, None] * g2).reshape(1, width * s2)
    cb2 = (w3[:, None] * b2).sum(0).reshape(1, s2)

    return dict(
        w1_mean=w1_mean, w1_sq_mean=w1_sq_mean,
        # conv-1x path
        a1x=jnp.asarray(a1x), b1x=jnp.asarray(b1x), c1x=jnp.asarray(c1x),
        # conv-3x path
        m_a=jnp.asarray(m_a), gm=jnp.asarray(gm), bm=jnp.asarray(bm),
        g2w3=jnp.asarray(g2w3), cb2=jnp.asarray(cb2),
        # bn3
        g3=jnp.asarray(g3), b3=jnp.asarray(b3),
    )


# ---------------------------------------------------------------------------
# Pure-JAX reference (mirrors the PyTorch forward, NCHW, full f32)
# ---------------------------------------------------------------------------
def adapter_reference(x, p, *, c_in, c_type, width=16):
    size = int(math.ceil(math.sqrt(c_in)))
    s2 = size * size
    xp = jnp.pad(x, ((0, 0), (0, s2 - c_in)))
    xi = xp.reshape(-1, 1, size, size)
    identity = xi
    dn = ('NCHW', 'OIHW', 'NCHW')
    prec = lax.Precision.HIGHEST

    def ln(t, gamma, beta):
        mu = jnp.mean(t, axis=(1, 2, 3), keepdims=True)
        var = jnp.mean((t - mu) ** 2, axis=(1, 2, 3), keepdims=True)
        return (t - mu) / jnp.sqrt(var + _EPS) * gamma + beta

    out = lax.conv_general_dilated(xi, p['w1'], (1, 1), 'VALID',
                                   dimension_numbers=dn, precision=prec)
    out = ln(out, p['g1'], p['b1'])
    if c_type == 'conv-3x':
        out = lax.conv_general_dilated(out, p['w2'], (1, 1), ((1, 1), (1, 1)),
                                       dimension_numbers=dn, precision=prec)
        out = ln(out, p['g2'], p['b2'])
    out = lax.conv_general_dilated(out, p['w3'], (1, 1), 'VALID',
                                   dimension_numbers=dn, precision=prec)
    out = ln(out, p['g3'], p['b3'])
    out = out + identity
    return out.reshape(-1, 1, s2)[:, :, :c_in].reshape(-1, c_in)


# ---------------------------------------------------------------------------
if __name__ == "__main__":
    C_IN = 14            # not a perfect square -> exercises the sqrt padding (size=4, S2=16)
    WIDTH = 16
    BATCH = 256          # enough rows for 2-4 grid steps depending on generation

    key = jax.random.PRNGKey(0)
    kx, kp = jax.random.split(key)
    x = jax.random.normal(kx, (BATCH, C_IN), jnp.float32)

    torch_like_params = init_adapter_params(kp, C_IN, WIDTH)
    kparams = fold_params_for_kernel(torch_like_params, C_IN, WIDTH)

    # NOTE: the module's self.relu is defined but never used in forward().
    for c_type in ('conv-3x', 'conv-1x'):
        out = adapter_forward(x, kparams, c_in=C_IN, c_type=c_type, width=WIDTH)
        out = jax.block_until_ready(out)
        ref = adapter_reference(x, torch_like_params, c_in=C_IN, c_type=c_type, width=WIDTH)
        assert out.shape == (BATCH, C_IN)
        # conv-3x: the single K=16 matmul uses f32 operands with f32 accumulation;
        # tolerance still covers a potentially reduced-precision MXU pass followed
        # by two LayerNorms vs. the f32-HIGHEST reference.
        tol = 5e-2 if c_type == 'conv-3x' else 1e-3
        np.testing.assert_allclose(np.asarray(out), np.asarray(ref), atol=tol, rtol=tol)

    print("KERNEL_OK")
</pallas_src>

<mosaic_0001>
module attributes {stable_mosaic.version = 11 : i64} {
  func.func @_adapter_kernel_conv3x(%arg0: i32, %arg1: memref<128x16xf32, #tpu.memory_space<vmem>>, %arg2: memref<16x256xf32, #tpu.memory_space<vmem>>, %arg3: memref<1x256xf32, #tpu.memory_space<vmem>>, %arg4: memref<1x256xf32, #tpu.memory_space<vmem>>, %arg5: memref<1x256xf32, #tpu.memory_space<vmem>>, %arg6: memref<1x16xf32, #tpu.memory_space<vmem>>, %arg7: memref<1x16xf32, #tpu.memory_space<vmem>>, %arg8: memref<1x16xf32, #tpu.memory_space<vmem>>, %arg9: memref<128x16xf32, #tpu.memory_space<vmem>>) attributes {dimension_semantics = [#tpu.dimension_semantics<parallel>], iteration_bounds = array<i64: 2>, scalar_prefetch = 0 : i64, scratch_operands = 0 : i64, tpu.core_type = #tpu.core_type<tc>, window_params = [{transform_indices = @transform_0, window_bounds = array<i64: 128, 16>}, {pipeline_mode = #tpu.pipeline_mode<synchronous>, transform_indices = @transform_1, window_bounds = array<i64: 16, 256>}, {pipeline_mode = #tpu.pipeline_mode<synchronous>, transform_indices = @transform_2, window_bounds = array<i64: 1, 256>}, {pipeline_mode = #tpu.pipeline_mode<synchronous>, transform_indices = @transform_3, window_bounds = array<i64: 1, 256>}, {pipeline_mode = #tpu.pipeline_mode<synchronous>, transform_indices = @transform_4, window_bounds = array<i64: 1, 256>}, {pipeline_mode = #tpu.pipeline_mode<synchronous>, transform_indices = @transform_5, window_bounds = array<i64: 1, 16>}, {pipeline_mode = #tpu.pipeline_mode<synchronous>, transform_indices = @transform_6, window_bounds = array<i64: 1, 16>}, {pipeline_mode = #tpu.pipeline_mode<synchronous>, transform_indices = @transform_7, window_bounds = array<i64: 1, 16>}, {transform_indices = @transform_8, window_bounds = array<i64: 128, 16>}]} {
    %c0 = arith.constant 0 : index
    %c0_0 = arith.constant 0 : index
    %0 = vector.load %arg1[%c0, %c0_0] : memref<128x16xf32, #tpu.memory_space<vmem>>, vector<128x16xf32>
    %cst = arith.constant dense<0.000000e+00> : vector<128xf32>
    %1 = vector.multi_reduction <add>, %0, %cst [1] : vector<128x16xf32> to vector<128xf32>
    %2 = vector.shape_cast %1 : vector<128xf32> to vector<128x1xf32>
    %cst_1 = arith.constant 1.600000e+01 : f32
    %3 = vector.broadcast %cst_1 : f32 to vector<128x1xf32>
    %4 = arith.divf %2, %3 : vector<128x1xf32>
    %5 = arith.mulf %0, %0 : vector<128x16xf32>
    %cst_2 = arith.constant dense<0.000000e+00> : vector<128xf32>
    %6 = vector.multi_reduction <add>, %5, %cst_2 [1] : vector<128x16xf32> to vector<128xf32>
    %7 = vector.shape_cast %6 : vector<128xf32> to vector<128x1xf32>
    %cst_3 = arith.constant 1.600000e+01 : f32
    %8 = vector.broadcast %cst_3 : f32 to vector<128x1xf32>
    %9 = arith.divf %7, %8 : vector<128x1xf32>
    %cst_4 = arith.constant -0.01292032 : f32
    %10 = vector.broadcast %cst_4 : f32 to vector<128x1xf32>
    %11 = arith.mulf %10, %4 : vector<128x1xf32>
    %cst_5 = arith.constant 0.121150672 : f32
    %12 = vector.broadcast %cst_5 : f32 to vector<128x1xf32>
    %13 = arith.mulf %12, %9 : vector<128x1xf32>
    %14 = arith.mulf %11, %11 : vector<128x1xf32>
    %15 = arith.subf %13, %14 : vector<128x1xf32>
    %cst_6 = arith.constant 9.99999974E-6 : f32
    %16 = vector.broadcast %cst_6 : f32 to vector<128x1xf32>
    %17 = arith.addf %15, %16 : vector<128x1xf32>
    %18 = math.rsqrt %17 : vector<128x1xf32>
    %c0_7 = arith.constant 0 : index
    %c0_8 = arith.constant 0 : index
    %19 = vector.load %arg2[%c0_7, %c0_8] : memref<16x256xf32, #tpu.memory_space<vmem>>, vector<16x256xf32>
    %cst_9 = arith.constant dense<0.000000e+00> : vector<128x256xf32>
    %20 = tpu.matmul %0, %19, %cst_9 {dimension_numbers = #tpu.dot_dimension_numbers<[1], [0], [0], [1], [0, 0, 1, 1], [], []>} : vector<128x16xf32>, vector<16x256xf32>, vector<128x256xf32> -> vector<128x256xf32>
    %21 = vector.broadcast %18 : vector<128x1xf32> to vector<128x256xf32>
    %22 = arith.mulf %21, %20 : vector<128x256xf32>
    %23 = arith.mulf %11, %18 : vector<128x1xf32>
    %c0_10 = arith.constant 0 : index
    %c0_11 = arith.constant 0 : index
    %24 = vector.load %arg3[%c0_10, %c0_11] : memref<1x256xf32, #tpu.memory_space<vmem>>, vector<1x256xf32>
    %25 = vector.broadcast %23 : vector<128x1xf32> to vector<128x256xf32>
    %26 = vector.broadcast %24 : vector<1x256xf32> to vector<128x256xf32>
    %27 = arith.mulf %25, %26 : vector<128x256xf32>
    %28 = arith.subf %22, %27 : vector<128x256xf32>
    %c0_12 = arith.constant 0 : index
    %c0_13 = arith.constant 0 : index
    %29 = vector.load %arg4[%c0_12, %c0_13] : memref<1x256xf32, #tpu.memory_space<vmem>>, vector<1x256xf32>
    %30 = vector.broadcast %29 : vector<1x256xf32> to vector<128x256xf32>
    %31 = arith.addf %28, %30 : vector<128x256xf32>
    %cst_14 = arith.constant dense<0.000000e+00> : vector<128xf32>
    %32 = vector.multi_reduction <add>, %31, %cst_14 [1] : vector<128x256xf32> to vector<128xf32>
    %33 = vector.shape_cast %32 : vector<128xf32> to vector<128x1xf32>
    %cst_15 = arith.constant 2.560000e+02 : f32
    %34 = vector.broadcast %cst_15 : f32 to vector<128x1xf32>
    %35 = arith.divf %33, %34 : vector<128x1xf32>
    %36 = arith.mulf %31, %31 : vector<128x256xf32>
    %cst_16 = arith.constant dense<0.000000e+00> : vector<128xf32>
    %37 = vector.multi_reduction <add>, %36, %cst_16 [1] : vector<128x256xf32> to vector<128xf32>
    %38 = vector.shape_cast %37 : vector<128xf32> to vector<128x1xf32>
    %cst_17 = arith.constant 2.560000e+02 : f32
    %39 = vector.broadcast %cst_17 : f32 to vector<128x1xf32>
    %40 = arith.divf %38, %39 : vector<128x1xf32>
    %41 = arith.mulf %35, %35 : vector<128x1xf32>
    %42 = arith.subf %40, %41 : vector<128x1xf32>
    %43 = vector.broadcast %35 : vector<128x1xf32> to vector<128x256xf32>
    %44 = arith.subf %31, %43 : vector<128x256xf32>
    %cst_18 = arith.constant 9.99999974E-6 : f32
    %45 = vector.broadcast %cst_18 : f32 to vector<128x1xf32>
    %46 = arith.addf %42, %45 : vector<128x1xf32>
    %47 = math.rsqrt %46 : vector<128x1xf32>
    %48 = vector.broadcast %47 : vector<128x1xf32> to vector<128x256xf32>
    %49 = arith.mulf %44, %48 : vector<128x256xf32>
    %c0_19 = arith.constant 0 : index
    %c0_20 = arith.constant 0 : index
    %50 = vector.load %arg5[%c0_19, %c0_20] : memref<1x256xf32, #tpu.memory_space<vmem>>, vector<1x256xf32>
    %51 = vector.broadcast %50 : vector<1x256xf32> to vector<128x256xf32>
    %52 = arith.mulf %49, %51 : vector<128x256xf32>
    %53 = vector.extract_strided_slice %52 {offsets = [0, 0], sizes = [128, 128], strides = [1, 1]} : vector<128x256xf32> to vector<128x128xf32>
    %54 = vector.extract_strided_slice %52 {offsets = [0, 128], sizes = [128, 128], strides = [1, 1]} : vector<128x256xf32> to vector<128x128xf32>
    %55 = arith.addf %53, %54 : vector<128x128xf32>
    %56 = vector.extract_strided_slice %55 {offsets = [0, 0], sizes = [128, 64], strides = [1, 1]} : vector<128x128xf32> to vector<128x64xf32>
    %57 = vector.extract_strided_slice %55 {offsets = [0, 64], sizes = [128, 64], strides = [1, 1]} : vector<128x128xf32> to vector<128x64xf32>
    %58 = arith.addf %56, %57 : vector<128x64xf32>
    %59 = vector.extract_strided_slice %58 {offsets = [0, 0], sizes = [128, 32], strides = [1, 1]} : vector<128x64xf32> to vector<128x32xf32>
    %60 = vector.extract_strided_slice %58 {offsets = [0, 32], sizes = [128, 32], strides = [1, 1]} : vector<128x64xf32> to vector<128x32xf32>
    %61 = arith.addf %59, %60 : vector<128x32xf32>
    %62 = vector.extract_strided_slice %61 {offsets = [0, 0], sizes = [128, 16], strides = [1, 1]} : vector<128x32xf32> to vector<128x16xf32>
    %63 = vector.extract_strided_slice %61 {offsets = [0, 16], sizes = [128, 16], strides = [1, 1]} : vector<128x32xf32> to vector<128x16xf32>
    %64 = arith.addf %62, %63 : vector<128x16xf32>
    %c0_21 = arith.constant 0 : index
    %c0_22 = arith.constant 0 : index
    %65 = vector.load %arg6[%c0_21, %c0_22] : memref<1x16xf32, #tpu.memory_space<vmem>>, vector<1x16xf32>
    %66 = vector.broadcast %65 : vector<1x16xf32> to vector<128x16xf32>
    %67 = arith.addf %64, %66 : vector<128x16xf32>
    %c0_23 = arith.constant 0 : index
    %c0_24 = arith.constant 0 : index
    %68 = vector.load %arg7[%c0_23, %c0_24] : memref<1x16xf32, #tpu.memory_space<vmem>>, vector<1x16xf32>
    %c0_25 = arith.constant 0 : index
    %c0_26 = arith.constant 0 : index
    %69 = vector.load %arg8[%c0_25, %c0_26] : memref<1x16xf32, #tpu.memory_space<vmem>>, vector<1x16xf32>
    %cst_27 = arith.constant dense<0.000000e+00> : vector<128xf32>
    %70 = vector.multi_reduction <add>, %67, %cst_27 [1] : vector<128x16xf32> to vector<128xf32>
    %71 = vector.shape_cast %70 : vector<128xf32> to vector<128x1xf32>
    %cst_28 = arith.constant 1.600000e+01 : f32
    %72 = vector.broadcast %cst_28 : f32 to vector<128x1xf32>
    %73 = arith.divf %71, %72 : vector<128x1xf32>
    %74 = arith.mulf %67, %67 : vector<128x16xf32>
    %cst_29 = arith.constant dense<0.000000e+00> : vector<128xf32>
    %75 = vector.multi_reduction <add>, %74, %cst_29 [1] : vector<128x16xf32> to vector<128xf32>
    %76 = vector.shape_cast %75 : vector<128xf32> to vector<128x1xf32>
    %cst_30 = arith.constant 1.600000e+01 : f32
    %77 = vector.broadcast %cst_30 : f32 to vector<128x1xf32>
    %78 = arith.divf %76, %77 : vector<128x1xf32>
    %79 = arith.mulf %73, %73 : vector<128x1xf32>
    %80 = arith.subf %78, %79 : vector<128x1xf32>
    %81 = vector.broadcast %73 : vector<128x1xf32> to vector<128x16xf32>
    %82 = arith.subf %67, %81 : vector<128x16xf32>
    %cst_31 = arith.constant 9.99999974E-6 : f32
    %83 = vector.broadcast %cst_31 : f32 to vector<128x1xf32>
    %84 = arith.addf %80, %83 : vector<128x1xf32>
    %85 = math.rsqrt %84 : vector<128x1xf32>
    %86 = vector.broadcast %85 : vector<128x1xf32> to vector<128x16xf32>
    %87 = arith.mulf %82, %86 : vector<128x16xf32>
    %88 = vector.broadcast %68 : vector<1x16xf32> to vector<128x16xf32>
    %89 = arith.mulf %87, %88 : vector<128x16xf32>
    %90 = vector.broadcast %69 : vector<1x16xf32> to vector<128x16xf32>
    %91 = arith.addf %89, %90 : vector<128x16xf32>
    %92 = arith.addf %91, %0 : vector<128x16xf32>
    %c0_32 = arith.constant 0 : index
    %c0_33 = arith.constant 0 : index
    %93 = vector.load %arg9[%c0_32, %c0_33] : memref<128x16xf32, #tpu.memory_space<vmem>>, vector<128x16xf32>
    tpu.vector_store %arg9[%c0_32, %c0_33], %92 {strides = array<i32>} : memref<128x16xf32, #tpu.memory_space<vmem>>, vector<128x16xf32>,
    return
  }
  func.func @transform_0(%arg0: i32) -> (i32, i32) {
    %c0_i32 = arith.constant 0 : i32
    %c0_i32_0 = arith.constant 0 : i32
    return %arg0, %c0_i32 : i32, i32
  }
  func.func @transform_1(%arg0: i32) -> (i32, i32) {
    %c0_i32 = arith.constant 0 : i32
    %c0_i32_0 = arith.constant 0 : i32
    %c0_i32_1 = arith.constant 0 : i32
    return %c0_i32, %c0_i32_0 : i32, i32
  }
  func.func @transform_2(%arg0: i32) -> (i32, i32) {
    %c0_i32 = arith.constant 0 : i32
    %c0_i32_0 = arith.constant 0 : i32
    %c0_i32_1 = arith.constant 0 : i32
    return %c0_i32, %c0_i32_0 : i32, i32
  }
  func.func @transform_3(%arg0: i32) -> (i32, i32) {
    %c0_i32 = arith.constant 0 : i32
    %c0_i32_0 = arith.constant 0 : i32
    %c0_i32_1 = arith.constant 0 : i32
    return %c0_i32, %c0_i32_0 : i32, i32
  }
  func.func @transform_4(%arg0: i32) -> (i32, i32) {
    %c0_i32 = arith.constant 0 : i32
    %c0_i32_0 = arith.constant 0 : i32
    %c0_i32_1 = arith.constant 0 : i32
    return %c0_i32, %c0_i32_0 : i32, i32
  }
  func.func @transform_5(%arg0: i32) -> (i32, i32) {
    %c0_i32 = arith.constant 0 : i32
    %c0_i32_0 = arith.constant 0 : i32
    %c0_i32_1 = arith.constant 0 : i32
    return %c0_i32, %c0_i32_0 : i32, i32
  }
  func.func @transform_6(%arg0: i32) -> (i32, i32) {
    %c0_i32 = arith.constant 0 : i32
    %c0_i32_0 = arith.constant 0 : i32
    %c0_i32_1 = arith.constant 0 : i32
    return %c0_i32, %c0_i32_0 : i32, i32
  }
  func.func @transform_7(%arg0: i32) -> (i32, i32) {
    %c0_i32 = arith.constant 0 : i32
    %c0_i32_0 = arith.constant 0 : i32
    %c0_i32_1 = arith.constant 0 : i32
    return %c0_i32, %c0_i32_0 : i32, i32
  }
  func.func @transform_8(%arg0: i32) -> (i32, i32) {
    %c0_i32 = arith.constant 0 : i32
    %c0_i32_0 = arith.constant 0 : i32
    return %arg0, %c0_i32 : i32, i32
  }
}

</mosaic_0001>

<bundles_post_ra>
// kernel: tpu_custom_call.1
= control target key start
LH: loop header
LB: loop body
LE: loop exit
PB: predicated region body
PF: predicated region fallthrough
CT: control target
= control target key end

     0   :  { %s2151_s27 = smov 0   ;;  %s3396_s0 = inlined_call_operand.vmem [shape: f32[256,16], index: 0, kind: input, shape index: {}]   ;;  %s3397_s1 = inlined_call_operand.vmem [shape: f32[16,256], index: 1, kind: input, shape index: {}]   ;;  %s3398_s2 = inlined_call_operand.vmem [shape: f32[1,256], index: 2, kind: input, shape index: {}]   ;;  %s3399_s3 = inlined_call_operand.vmem [shape: f32[1,256], index: 3, kind: input, shape index: {}]   ;;  %s3400_s4 = inlined_call_operand.vmem [shape: f32[1,256], index: 4, kind: input, shape index: {}]   ;;  %s3401_s5 = inlined_call_operand.vmem [shape: f32[1,16], index: 5, kind: input, shape index: {}]   ;;  %s3402_s6 = inlined_call_operand.vmem [shape: f32[1,16], index: 6, kind: input, shape index: {}]   ;;  %s3403_s7 = inlined_call_operand.vmem [shape: f32[1,16], index: 7, kind: input, shape index: {}]   ;;  %s3404_s8 = inlined_call_operand.vmem [shape: f32[256,16], index: 8, kind: output, shape index: {}]  }
   0x1 LB: > { %s1934_s28 = sadd.s32 4294967295, %s2100_s27   ;;  %p1938_p0 = scmp.ge.s32.totalorder %s2100_s27, 1  ;;  %s2100_s27 = sphi %s2151_s27, %s18_s27  }
   0x2   : > { %p263_p1 = scmp.lt.s32.totalorder %s2100_s27, 3 }
   0x4   : > { %p264_p2 = pnand %p1938_p0, %p263_p1 }
   0x6   : > { %267 = sbr.rel (%p264_p2) target bundleno = 1006 (0x3ee), region = 52 }
   0xd   : > { %v568_v0 = vld [vmem:[%s3397_s1 + $0x8] sm:$0xff]  ;;  %v570_v1 = vld [vmem:[%s3397_s1 + $0x18] sm:$0xff]  ;;  %v567_v2 = vld [vmem:[%s3397_s1] sm:$0xff]  ;;  %s1939_s13 = sshll.u32 %s1934_s28, 4  ;;  %v2102_v5 = vmov 0.0   ;;  %vm325_vm0 = vcmask 130048  }
   0xe   : > { %v1964_v3 = vpack.c.bf16 %v570_v1, %v568_v0  ;;  %v569_v4 = vld [vmem:[%s3397_s1 + $0x10] sm:$0xff]  ;;  %683 = vmatprep.mubr.f32.mxu0 %v2102_v5  ;;  %731 = vmatprep.mubr.f32.mxu1 %v2102_v5  ;;  %p298_p3 = scmp.lt.s32.totalorder %s1939_s13, 31  ;;  %s2103_s26 = smov 64  }
   0xf   : > { %v1966_v6 = vpack.c.bf16 %v569_v4, %v567_v2  ;;  %s2104_s28 = smov 96   ;;  %s2105_s29 = smov 112  }
  0x10   : > { %1965 = vmatprep.subr.bf16.mxu0 %v1964_v3  ;;  %1968 = vmatprep.subr.bf16.mxu1 %v1964_v3  ;;  %s3421_s13 = smov (!%p298_p3, %s1939_s13), 31 }
  0x11   : > { %1967 = vmatpush1.bf16.msra.mxu0 %v1966_v6  ;;  %1969 = vmatpush1.bf16.msra.mxu1 %v1966_v6  ;;  %s1940_s16 = sshll.u32 %s3421_s13, 3 }
  0x12   : > { %s2181_s19 = scalar_lea.vmem %s3396_s0, %s1940_s16  ;;  %s3254_s18 = scalar_lea.vmem %s3404_s8, %s1940_s16 }
  0x13   : > { %v2184_v7 = vld [vmem:[%s2181_s19] sm:$0xff]  ;;  %v2190_v9 = vld [vmem:[%s2181_s19 + $0x10] sm:$0xff]  ;;  %v2201_v12 = vld [vmem:[%s2181_s19 + $0x8] sm:$0xff] }
  0x14   : > { %v2187_v8 = vld [vmem:[%s2181_s19 + $0x40] sm:$0xff]  ;;  %1943 = vmatmul.mubr.msk.f32.vlgmr.msra.gmra.mrb[0].mxu0 %vm325_vm0, %v2184_v7  ;;  %v332_v10 = vsel %vm325_vm0, %v2190_v9, 0.0  ;;  %v326_v11 = vsel %vm325_vm0, %v2184_v7, 0.0  ;;  %v2204_v13 = vld [vmem:[%s2181_s19 + $0x18] sm:$0xff]  ;;  %v2207_v14 = vld [vmem:[%s2181_s19 + $0x48] sm:$0xff]  ;;  %v329_v16 = vsel %vm325_vm0, %v2201_v12, 0.0  ;;  %v392_v39 = vmul.f32 %v2201_v12, %v2201_v12 }
  0x15   : > { %1951 = vmatmul.mubr.msk.f32.vlgmr.msra.gmra.mrb[0].mxu1 %vm325_vm0, %v2187_v8  ;;  %333 = vadd.xlane.f32.xlu1 %v332_v10  ;;  %v335_v15 = vsel %vm325_vm0, %v2204_v13, 0.0  ;;  %v2216_v17 = vld [vmem:[%s2181_s19 + $0x28] sm:$0xff]  ;;  %v2219_v18 = vld [vmem:[%s2181_s19 + $0x20] sm:$0xff]  ;;  %v2226_v19 = vld [vmem:[%s2181_s19 + $0x50] sm:$0xff]  ;;  %v353_v28 = vsel %vm325_vm0, %v2207_v14, 0.0  ;;  %v350_v29 = vsel %vm325_vm0, %v2187_v8, 0.0  ;;  %v391_v40 = vmul.f32 %v2184_v7, %v2184_v7 }
  0x16   : > { %327 = vadd.xlane.f32.xlu0 %v326_v11  ;;  %689 = vmatprep.mubr.f32.mxu0 %v2102_v5  ;;  %v341_v20 = vsel %vm325_vm0, %v2216_v17, 0.0  ;;  %v338_v21 = vsel %vm325_vm0, %v2219_v18, 0.0  ;;  %v2235_v22 = vld [vmem:[%s2181_s19 + $0x38] sm:$0xff]  ;;  %v2238_v23 = vld [vmem:[%s2181_s19 + $0x30] sm:$0xff]  ;;  %v2258_v27 = vld [vmem:[%s2181_s19 + $0x60] sm:$0xff]  ;;  %v356_v32 = vsel %vm325_vm0, %v2226_v19, 0.0  ;;  %v394_v43 = vmul.f32 %v2204_v13, %v2204_v13 }
  0x17   : > { %737 = vmatprep.mubr.f32.mxu1 %v2102_v5  ;;  %v2245_v24 = vld [vmem:[%s2181_s19 + $0x58] sm:$0xff]  ;;  %v347_v25 = vsel %vm325_vm0, %v2235_v22, 0.0  ;;  %v344_v26 = vsel %vm325_vm0, %v2238_v23, 0.0  ;;  %v322_v30 = vld [vmem:[%s2181_s19 + $0x68] sm:$0xff]  ;;  %v323_v33 = vld [vmem:[%s2181_s19 + $0x70] sm:$0xff]  ;;  %v362_v35 = vsel %vm325_vm0, %v2258_v27, 0.0  ;;  %v393_v44 = vmul.f32 %v2190_v9, %v2190_v9 }
  0x18   : > { %1944 = vmatmul.mubr.msk.f32.gmra.mrb[2].mxu0 %vm325_vm0, %v2201_v12  ;;  %v359_v31 = vsel %vm325_vm0, %v2245_v24, 0.0  ;;  %v365_v34 = vsel %vm325_vm0, %v322_v30, 0.0  ;;  %v324_v36 = vld [vmem:[%s2181_s19 + $0x78] sm:$0xff]  ;;  %v368_v38 = vsel %vm325_vm0, %v323_v33, 0.0  ;;  %v410_v41 = vsel %vm325_vm0, %v392_v39, 0.0 }
  0x19   : > { %1952 = vmatmul.mubr.msk.f32.gmra.mrb[2].mxu1 %vm325_vm0, %v2207_v14  ;;  %336 = vadd.xlane.f32.xlu1 %v335_v15  ;;  %v371_v37 = vsel %vm325_vm0, %v324_v36, 0.0  ;;  %v407_v42 = vsel %vm325_vm0, %v391_v40, 0.0  ;;  %v416_v45 = vsel %vm325_vm0, %v394_v43, 0.0  ;;  %v413_v46 = vsel %vm325_vm0, %v393_v44, 0.0 }
  0x1a   : > { %330 = vadd.xlane.f32.xlu0 %v329_v16  ;;  %695 = vmatprep.mubr.f32.mxu0 %v2102_v5  ;;  %v396_v47 = vmul.f32 %v2216_v17, %v2216_v17  ;;  %v395_v48 = vmul.f32 %v2219_v18, %v2219_v18  ;;  %v398_v51 = vmul.f32 %v2235_v22, %v2235_v22  ;;  %v830_v43 = vlaneseq }
  0x1b   : > { %743 = vmatprep.mubr.f32.mxu1 %v2102_v5  ;;  %v397_v52 = vmul.f32 %v2238_v23, %v2238_v23  ;;  %v400_v55 = vmul.f32 %v2207_v14, %v2207_v14  ;;  %v399_v56 = vmul.f32 %v2187_v8, %v2187_v8  ;;  %v402_v59 = vmul.f32 %v2245_v24, %v2245_v24 }
  0x1c   : > { %1945 = vmatmul.mubr.msk.f32.gmra.mrb[4].mxu0 %vm325_vm0, %v2190_v9  ;;  %v422_v49 = vsel %vm325_vm0, %v396_v47, 0.0  ;;  %v419_v50 = vsel %vm325_vm0, %v395_v48, 0.0  ;;  %v428_v53 = vsel %vm325_vm0, %v398_v51, 0.0  ;;  %v401_v60 = vmul.f32 %v2226_v19, %v2226_v19 }
  0x1d   : > { %1953 = vmatmul.mubr.msk.f32.gmra.mrb[4].mxu1 %vm325_vm0, %v2226_v19  ;;  %342 = vadd.xlane.f32.xlu1 %v341_v20  ;;  %v425_v54 = vsel %vm325_vm0, %v397_v52, 0.0  ;;  %v434_v57 = vsel %vm325_vm0, %v400_v55, 0.0  ;;  %v431_v58 = vsel %vm325_vm0, %v399_v56, 0.0  ;;  %v440_v61 = vsel %vm325_vm0, %v402_v59, 0.0 }
  0x1e   : > { %339 = vadd.xlane.f32.xlu0 %v338_v21  ;;  %701 = vmatprep.mubr.f32.mxu0 %v2102_v5  ;;  %v437_v62 = vsel %vm325_vm0, %v401_v60, 0.0  ;;  %v404_v63 = vmul.f32 %v322_v30, %v322_v30  ;;  %v403_v0 = vmul.f32 %v2258_v27, %v2258_v27  ;;  %v406_v3 = vmul.f32 %v324_v36, %v324_v36 }
  0x1f   : > { %749 = vmatprep.mubr.f32.mxu1 %v2102_v5  ;;  %v405_v4 = vmul.f32 %v323_v33, %v323_v33  ;;  %v831_v51 = vshrl.u32 %v830_v43, 7 }
  0x20   : > { %1946 = vmatmul.mubr.msk.f32.gmra.mrb[6].mxu0 %vm325_vm0, %v2204_v13  ;;  %v446_v1 = vsel %vm325_vm0, %v404_v63, 0.0  ;;  %v443_v2 = vsel %vm325_vm0, %v403_v0, 0.0 }
  0x21   : > { %1954 = vmatmul.mubr.msk.f32.gmra.mrb[6].mxu1 %vm325_vm0, %v2245_v24  ;;  %348 = vadd.xlane.f32.xlu1 %v347_v25  ;;  %v449_v6 = vsel %vm325_vm0, %v405_v4, 0.0  ;;  %v2377_v63 = vsub.s32 0, %v831_v51  ;;  %v2379_v0 = vsub.s32 1, %v831_v51  ;;  %v828_v4 = vld [vmem:[%s3398_s2] sm:$0x3] }
  0x22   : > { %345 = vadd.xlane.f32.xlu0 %v344_v26  ;;  %707 = vmatprep.mubr.f32.mxu0 %v2102_v5 }
  0x23   : > { %755 = vmatprep.mubr.f32.mxu1 %v2102_v5  ;;  %3410 = vst [vmem:[#allocation2_spill] sm:$0xff] %v2379_v0 }
  0x24   : > { %1947 = vmatmul.mubr.msk.f32.gmra.mrb[8].mxu0 %vm325_vm0, %v2219_v18 }
  0x25   : > { %1955 = vmatmul.mubr.msk.f32.gmra.mrb[8].mxu1 %vm325_vm0, %v2258_v27  ;;  %354 = vadd.xlane.f32.xlu1 %v353_v28 }
  0x26   : > { %351 = vadd.xlane.f32.xlu0 %v350_v29  ;;  %713 = vmatprep.mubr.f32.mxu0 %v2102_v5 }
  0x27   : > { %761 = vmatprep.mubr.f32.mxu1 %v2102_v5 }
  0x28   : > { %1948 = vmatmul.mubr.msk.f32.gmra.mrb[10].mxu0 %vm325_vm0, %v2216_v17 }
  0x29   : > { %1956 = vmatmul.mubr.msk.f32.gmra.mrb[10].mxu1 %vm325_vm0, %v322_v30  ;;  %360 = vadd.xlane.f32.xlu1 %v359_v31 }
  0x2a   : > { %357 = vadd.xlane.f32.xlu0 %v356_v32  ;;  %719 = vmatprep.mubr.f32.mxu0 %v2102_v5 }
  0x2b   : > { %767 = vmatprep.mubr.f32.mxu1 %v2102_v5 }
  0x2c   : > { %1949 = vmatmul.mubr.msk.f32.gmra.mrb[12].mxu0 %vm325_vm0, %v2238_v23 }
  0x2d   : > { %1957 = vmatmul.mubr.msk.f32.gmra.mrb[12].mxu1 %vm325_vm0, %v323_v33  ;;  %366 = vadd.xlane.f32.xlu1 %v365_v34 }
  0x2e   : > { %363 = vadd.xlane.f32.xlu0 %v362_v35  ;;  %725 = vmatprep.mubr.f32.mxu0 %v2102_v5 }
  0x2f   : > { %773 = vmatprep.mubr.f32.mxu1 %v2102_v5  ;;  %v452_v5 = vsel %vm325_vm0, %v406_v3, 0.0 }
  0x30   : > { %1950 = vmatmul.mubr.msk.f32.gmra.mrb[14].mxu0 %vm325_vm0, %v2235_v22 }
  0x31   : > { %1958 = vmatmul.mubr.msk.f32.gmra.mrb[14].mxu1 %vm325_vm0, %v324_v36  ;;  %372 = vadd.xlane.f32.xlu1 %v371_v37 }
  0x32   : > { %369 = vadd.xlane.f32.xlu0 %v368_v38 }
  0x35   : > { %411 = vadd.xlane.f32.xlu1 %v410_v41 }
  0x36   : > { %408 = vadd.xlane.f32.xlu0 %v407_v42 }
  0x39   : > { %417 = vadd.xlane.f32.xlu1 %v416_v45 }
  0x3a   : > { %414 = vadd.xlane.f32.xlu0 %v413_v46 }
  0x3d   : > { %423 = vadd.xlane.f32.xlu1 %v422_v49 }
  0x3e   : > { %420 = vadd.xlane.f32.xlu0 %v419_v50 }
  0x41   : > { %429 = vadd.xlane.f32.xlu1 %v428_v53 }
  0x42   : > { %426 = vadd.xlane.f32.xlu0 %v425_v54 }
  0x45   : > { %435 = vadd.xlane.f32.xlu1 %v434_v57 }
  0x46   : > { %432 = vadd.xlane.f32.xlu0 %v431_v58 }
  0x49   : > { %441 = vadd.xlane.f32.xlu1 %v440_v61 }
  0x4a   : > { %438 = vadd.xlane.f32.xlu0 %v437_v62 }
  0x4d   : > { %447 = vadd.xlane.f32.xlu1 %v446_v1 }
  0x4e   : > { %444 = vadd.xlane.f32.xlu0 %v443_v2 }
  0x51   : > { %453 = vadd.xlane.f32.xlu1 %v452_v5 }
  0x52   : > { %450 = vadd.xlane.f32.xlu0 %v449_v6 }
  0xa2   : > { %v334_v7 = vpop.xlane.xlu1 %333 }
  0xa3   : > { %v328_v8 = vpop.xlane.xlu0 %327  ;;  %v377_v55 = vmul.f32 0.0625, %v334_v7 }
  0xa4   : > { %v375_v25 = vmul.f32 0.0625, %v328_v8 }
  0xa5   : > { %v2386_v5 = vmul.f32 -0.01292032, %v377_v55 }
  0xa6   : > { %v337_v9 = vpop.xlane.xlu1 %336  ;;  %v2355_v30 = vmul.f32 -0.01292032, %v375_v25  ;;  %v904_v25 = vld [vmem:[%s3399_s3] sm:$0x3] }
  0xa7   : > { %v331_v10 = vpop.xlane.xlu0 %330  ;;  %v378_v52 = vmul.f32 0.0625, %v337_v9 }
  0xa8   : > { %v376_v29 = vmul.f32 0.0625, %v331_v10  ;;  %v503_v36 = vmul.f32 %v2355_v30, %v2355_v30 }
  0xa9   : > { %v2381_v1 = vmul.f32 -0.01292032, %v378_v52 }
  0xaa   : > { %v343_v11 = vpop.xlane.xlu1 %342  ;;  %v2359_v35 = vmul.f32 -0.01292032, %v376_v29 }
  0xab   : > { %v2339_v12 = vpop.xlane.xlu0 %339  ;;  %v380_v6 = vmul.f32 0.0625, %v343_v11  ;;  %v506_v11 = vmul.f32 %v2381_v1, %v2381_v1 }
  0xac   : > { %v504_v44 = vmul.f32 %v2359_v35, %v2359_v35 }
  0xae   : > { %v2341_v13 = vpop.xlane.xlu1 %348 }
  0xaf   : > { %v2343_v14 = vpop.xlane.xlu0 %345 }
  0xb2   : > { %v355_v15 = vpop.xlane.xlu1 %354 }
  0xb3   : > { %v352_v16 = vpop.xlane.xlu0 %351  ;;  %v384_v37 = vmul.f32 0.0625, %v355_v15 }
  0xb4   : > { %v383_v38 = vmul.f32 0.0625, %v352_v16  ;;  %v379_v16 = vmul.f32 0.0625, %v2339_v12  ;;  %v505_v12 = vmul.f32 %v2386_v5, %v2386_v5 }
  0xb5   : > { %v2369_v45 = vmul.f32 -0.01292032, %v384_v37 }
  0xb6   : > { %v2345_v17 = vpop.xlane.xlu1 %360  ;;  %v2371_v46 = vmul.f32 -0.01292032, %v383_v38  ;;  %v2409_v38 = vrot.slane %v904_v25, %v2377_v63 }
  0xb7   : > { %v358_v18 = vpop.xlane.xlu0 %357  ;;  %v512_v56 = vmul.f32 %v2369_v45, %v2369_v45 }
  0xb8   : > { %v511_v58 = vmul.f32 %v2371_v46, %v2371_v46  ;;  %v385_v7 = vmul.f32 0.0625, %v358_v18  ;;  %v386_v18 = vmul.f32 0.0625, %v2345_v17  ;;  %v382_v17 = vmul.f32 0.0625, %v2341_v13 }
  0xba   : > { %v2347_v19 = vpop.xlane.xlu1 %366  ;;  %v2437_v55 = vmul.f32 -0.01292032, %v382_v17 }
  0xbb   : > { %v2349_v20 = vpop.xlane.xlu0 %363 }
  0xbc   : > { %v387_v29 = vmul.f32 0.0625, %v2349_v20  ;;  %v388_v20 = vmul.f32 0.0625, %v2347_v19 }
  0xbe   : > { %v2351_v21 = vpop.xlane.xlu1 %372 }
  0xbf   : > { %v2353_v22 = vpop.xlane.xlu0 %369  ;;  %v390_v13 = vmul.f32 0.0625, %v2351_v21 }
  0xc2   : > { %v412_v23 = vpop.xlane.xlu1 %411 }
  0xc3   : > { %v409_v24 = vpop.xlane.xlu0 %408  ;;  %v456_v31 = vmul.f32 0.0625, %v412_v23 }
  0xc4   : > { %v455_v26 = vmul.f32 0.0625, %v409_v24  ;;  %v2390_v24 = vrot.slane %v828_v4, %v2377_v63 }
  0xc5   : > { %v488_v39 = vmul.f32 0.12115067, %v456_v31  ;;  %v2406_v31 = vmul.f32 -0.01292032, %v385_v7 }
  0xc6   : > { %v418_v27 = vpop.xlane.xlu1 %417  ;;  %v487_v32 = vmul.f32 0.12115067, %v455_v26  ;;  %v2396_v26 = vrot.slane %v828_v4, %v2379_v0 }
  0xc7   : > { %v415_v28 = vpop.xlane.xlu0 %414  ;;  %v520_v47 = vsub.f32 %v488_v39, %v504_v44  ;;  %v458_v57 = vmul.f32 0.0625, %v418_v27  ;;  %v2411_v39 = vmul.f32 -0.01292032, %v379_v16  ;;  %v2415_v44 = vmul.f32 -0.01292032, %v386_v18 }
  0xc8   : > { %v519_v40 = vsub.f32 %v487_v32, %v503_v36  ;;  %v457_v62 = vmul.f32 0.0625, %v415_v28  ;;  %v2403_v28 = vmul.f32 -0.01292032, %v380_v6 }
  0xc9   : > { %v536_v59 = vadd.f32 1e-05, %v520_v47  ;;  %v490_v9 = vmul.f32 0.12115067, %v458_v57  ;;  %v514_v21 = vmul.f32 %v2415_v44, %v2415_v44 }
  0xca   : > { %v2357_v33 = vpop.xlane.xlu1 %423  ;;  %v535_v48 = vadd.f32 1e-05, %v519_v40  ;;  %v489_v23 = vmul.f32 0.12115067, %v457_v62  ;;  %v381_v40 = vmul.f32 0.0625, %v2343_v14  ;;  %v513_v14 = vmul.f32 %v2406_v31, %v2406_v31 }
  0xcb   : > { %v421_v34 = vpop.xlane.xlu0 %420  ;;  %v522_v32 = vsub.f32 %v490_v9, %v506_v11  ;;  %v460_v19 = vmul.f32 0.0625, %v2357_v33 }
  0xcc   : > { %1982 = vrsqrt.f32 %v535_v48  ;;  %v459_v36 = vmul.f32 0.0625, %v421_v34  ;;  %v521_v43 = vsub.f32 %v489_v23, %v505_v12  ;;  %v2419_v48 = vrot.slane %v904_v25, %v2379_v0 }
  0xcd   : > { %1984 = vrsqrt.f32 %v536_v59  ;;  %v538_v52 = vadd.f32 1e-05, %v522_v32  ;;  %v2443_v59 = vmul.f32 -0.01292032, %v388_v20  ;;  %v2455_v7 = vmul.f32 0.12115067, %v460_v19 }
  0xce   : > { %v2363_v41 = vpop.xlane.xlu1 %429  ;;  %v537_v57 = vadd.f32 1e-05, %v521_v43 }
  0xcf   : > { %v2365_v42 = vpop.xlane.xlu0 %426  ;;  %v462_v9 = vmul.f32 0.0625, %v2363_v41 }
  0xd2   : > { %v436_v49 = vpop.xlane.xlu1 %435 }
  0xd3   : > { %v433_v50 = vpop.xlane.xlu0 %432  ;;  %v464_v53 = vmul.f32 0.0625, %v436_v49  ;;  %v2423_v49 = vmul.f32 %v2403_v28, %v2403_v28 }
  0xd4   : > { %v463_v54 = vmul.f32 0.0625, %v433_v50  ;;  %v2425_v50 = vmul.f32 -0.01292032, %v387_v29 }
  0xd5   : > { %v496_v60 = vmul.f32 0.12115067, %v464_v53  ;;  %v2431_v53 = vmul.f32 0.12115067, %v459_v36 }
  0xd6   : > { %v495_v61 = vmul.f32 0.12115067, %v463_v54  ;;  %v442_v37 = vpop.xlane.xlu1 %441  ;;  %v1983_v34 = vpop.eup %1982  ;;  %v2435_v54 = vmul.f32 %v2411_v39, %v2411_v39  ;;  %v2448_v62 = vmul.f32 %v2425_v50, %v2425_v50 }
  0xd7   : > { %v528_v2 = vsub.f32 %v496_v60, %v512_v56  ;;  %v439_v8 = vpop.xlane.xlu0 %438  ;;  %v466_v51 = vmul.f32 0.0625, %v442_v37  ;;  %v2439_v56 = vmul.f32 -0.01292032, %v381_v40  ;;  %v812_v33 = vmul.f32 %v1983_v34, %v2355_v30 }
  0xd8   : > { %v527_v3 = vsub.f32 %v495_v61, %v511_v58  ;;  %v465_v27 = vmul.f32 0.0625, %v439_v8  ;;  %v1985_v58 = vpop.eup %1984  ;;  %v523_v8 = vsub.f32 %v2431_v53, %v2435_v54 }
  0xd9   : > { %v544_v10 = vadd.f32 1e-05, %v528_v2  ;;  %v2450_v2 = vmul.f32 -0.01292032, %v390_v13  ;;  %v498_v4 = vmul.f32 0.12115067, %v466_v51  ;;  %v840_v11 = vmul.f32 %v2390_v24, %v812_v33 }
  0xda   : > { %v543_v15 = vadd.f32 1e-05, %v527_v3  ;;  %v497_v47 = vmul.f32 0.12115067, %v465_v27  ;;  %v2453_v3 = vmul.f32 0.0625, %v2353_v22  ;;  %v813_v22 = vmul.f32 %v1985_v58, %v2359_v35 }
  0xdb   : > { %1986 = vrsqrt.f32 %v544_v10  ;;  %v445_v61 = vpop.xlane.xlu0 %444  ;;  %v2461_v10 = vmul.f32 0.0625, %v2365_v42  ;;  %v841_v12 = vmul.f32 %v2396_v26, %v812_v33  ;;  %v530_v29 = vsub.f32 %v498_v4, %v514_v21 }
  0xdc   : > { %1988 = vrsqrt.f32 %v543_v15  ;;  %v529_v60 = vsub.f32 %v497_v47, %v513_v14  ;;  %v448_v15 = vpop.xlane.xlu1 %447  ;;  %v467_v16 = vmul.f32 0.0625, %v445_v61  ;;  %v842_v13 = vmul.f32 %v2390_v24, %v813_v22 }
  0xdd   : > { %1990 = vrsqrt.f32 %v538_v52  ;;  %v468_v51 = vmul.f32 0.0625, %v448_v15  ;;  %v546_v61 = vadd.f32 1e-05, %v530_v29 }
  0xde   : > { %1992 = vrsqrt.f32 %v537_v57  ;;  %v545_v23 = vadd.f32 1e-05, %v529_v60  ;;  %v499_v20 = vmul.f32 0.12115067, %v467_v16 }
  0xe0   : > { %1994 = vrsqrt.f32 %v545_v23  ;;  %v531_v15 = vsub.f32 %v499_v20, %v2448_v62 }
  0xe1   : > { %1996 = vrsqrt.f32 %v546_v61 }
  0xe2   : > { %v547_v20 = vadd.f32 1e-05, %v531_v15 }
  0xe5   : > { %v1987_v6 = vpop.eup %1986 }
  0xe6   : > { %v1989_v30 = vpop.eup %1988  ;;  %v821_v42 = vmul.f32 %v1987_v6, %v2369_v45 }
  0xe7   : > { %v685_v25 = vpop.f32.mrb[0].mxu0  ;;  %v820_v27 = vmul.f32 %v1989_v30, %v2371_v46  ;;  %v843_v46 = vmul.f32 %v2396_v26, %v813_v22 }
  0xe8   : > { %v733_v18 = vpop.f32.mrb[0].mxu1  ;;  %v780_v41 = vmul.f32 %v1983_v34, %v685_v25  ;;  %v687_v36 = vpop.f32.mrb[1].mxu0  ;;  %v858_v4 = vmul.f32 %v2390_v24, %v821_v42  ;;  %v859_v23 = vmul.f32 %v2396_v26, %v821_v42  ;;  %v494_v42 = vmul.f32 0.12115067, %v462_v9 }
  0xe9   : > { %v796_v32 = vmul.f32 %v1989_v30, %v733_v18  ;;  %v735_v37 = vpop.f32.mrb[1].mxu1  ;;  %v856_v17 = vmul.f32 %v2390_v24, %v820_v27  ;;  %v781_v40 = vmul.f32 %v1983_v34, %v687_v36  ;;  %v857_v43 = vmul.f32 %v2396_v26, %v820_v27  ;;  %v2481_v25 = vpop.eup %1990 }
  0xea   : > { %v797_v35 = vmul.f32 %v1989_v30, %v735_v37  ;;  %v872_v47 = vsub.f32 %v780_v41, %v840_v11  ;;  %v524_v11 = vsub.f32 %v2455_v7, %v2423_v49  ;;  %v539_v7 = vadd.f32 1e-05, %v523_v8 }
  0xeb   : > { %v888_v14 = vsub.f32 %v796_v32, %v856_v17  ;;  %v873_v52 = vsub.f32 %v781_v40, %v841_v12  ;;  %v691_v19 = vpop.f32.mrb[2].mxu0  ;;  %v1993_v32 = vpop.eup %1992  ;;  %v510_v40 = vmul.f32 %v2437_v55, %v2437_v55 }
  0xec   : > { %v739_v53 = vpop.f32.mrb[2].mxu1  ;;  %v2473_v45 = vadd.f32 %v2409_v38, %v872_v47  ;;  %v889_v54 = vsub.f32 %v797_v35, %v857_v43  ;;  %v782_v34 = vmul.f32 %v1985_v58, %v691_v19  ;;  %v693_v21 = vpop.f32.mrb[3].mxu0  ;;  %v493_v35 = vmul.f32 0.12115067, %v2461_v10 }
  0xed   : > { %v798_v57 = vmul.f32 %v1987_v6, %v739_v53  ;;  %v741_v60 = vpop.f32.mrb[3].mxu1  ;;  %v2476_v33 = vadd.f32 %v2419_v48, %v873_v52  ;;  %v783_v30 = vmul.f32 %v1985_v58, %v693_v21  ;;  %v2488_v58 = vadd.f32 %v2409_v38, %v888_v14  ;;  %v451_v47 = vpop.xlane.xlu0 %450 }
  0xee   : > { %v874_v16 = vsub.f32 %v782_v34, %v842_v13  ;;  %v799_v22 = vmul.f32 %v1987_v6, %v741_v60  ;;  %v2491_v62 = vadd.f32 %v2419_v48, %v889_v54  ;;  %v500_v43 = vmul.f32 0.12115067, %v468_v51 }
  0xef   : > { %v890_v18 = vsub.f32 %v798_v57, %v858_v4  ;;  %v875_v27 = vsub.f32 %v783_v30, %v843_v46  ;;  %v697_v12 = vpop.f32.mrb[4].mxu0  ;;  %v948_v41 = vadd.f32 %v2476_v33, %v2473_v45  ;;  %3411 = vst [vmem:[#allocation3_spill] sm:$0xff] %v2488_v58  ;;  %v509_v13 = vmul.f32 %v2439_v56, %v2439_v56  ;;  %v1995_v57 = vpop.eup %1994 }
  0xf0   : > { %v745_v29 = vpop.f32.mrb[4].mxu1  ;;  %3412 = vst [vmem:[#allocation4_spill] sm:$0xff] %v2491_v62  ;;  %v2494_v6 = vadd.f32 %v2409_v38, %v874_v16  ;;  %v891_v36 = vsub.f32 %v799_v22, %v859_v23  ;;  %v699_v37 = vpop.f32.mrb[5].mxu0  ;;  %v516_v10 = vmul.f32 %v2443_v59, %v2443_v59  ;;  %v2518_v51 = vmul.f32 %v2450_v2, %v2450_v2 }
  0xf1   : > { %v747_v49 = vpop.f32.mrb[5].mxu1  ;;  %v2497_v17 = vadd.f32 %v2419_v48, %v875_v27  ;;  %949 = vadd.xlane.f32.xlu0 %v948_v41  ;;  %v2505_v46 = vadd.f32 %v2409_v38, %v890_v18  ;;  %v2521_v19 = vmul.f32 -0.01292032, %v2453_v3  ;;  %v972_v34 = vadd.f32 %v2491_v62, %v2488_v58 }
  0xf2   : > { %3413 = vst [vmem:[#allocation5_spill] sm:$0xff] %v2494_v6  ;;  %v2508_v8 = vadd.f32 %v2419_v48, %v891_v36  ;;  %v540_v21 = vadd.f32 1e-05, %v524_v11  ;;  %1998 = vrsqrt.f32 %v539_v7  ;;  %v526_v60 = vsub.f32 %v494_v42, %v510_v40  ;;  %v454_v40 = vpop.xlane.xlu1 %453 }
  0xf3   : > { %3414 = vst [vmem:[#allocation6_spill] sm:$0xff] %v2497_v17  ;;  %v703_v9 = vpop.f32.mrb[6].mxu0  ;;  %v951_v52 = vadd.f32 %v2497_v17, %v2494_v6  ;;  %v814_v61 = vmul.f32 %v1993_v32, %v2386_v5  ;;  %v525_v4 = vsub.f32 %v493_v35, %v509_v13  ;;  %v532_v30 = vsub.f32 %v500_v43, %v516_v10 }
  0xf4   : > { %v2510_v14 = vpop.f32.mrb[6].mxu1  ;;  %v705_v53 = vpop.f32.mrb[7].mxu0  ;;  %2000 = vrsqrt.f32 %v547_v20  ;;  %v469_v15 = vmul.f32 0.0625, %v451_v47  ;;  %v815_v3 = vmul.f32 %v2481_v25, %v2381_v1  ;;  %v975_v23 = vadd.f32 %v2508_v8, %v2505_v46 }
  0xf5   : > { %v2523_v54 = vpop.f32.mrb[7].mxu1  ;;  %952 = vadd.xlane.f32.xlu1 %v951_v52  ;;  %973 = vadd.xlane.f32.xlu0 %v972_v34  ;;  %v1013_v11 = vmul.f32 %v2473_v45, %v2473_v45  ;;  %v1014_v5 = vmul.f32 %v2476_v33, %v2476_v33  ;;  %v517_v18 = vmul.f32 %v2521_v19, %v2521_v19  ;;  %2002 = vrsqrt.f32 %v540_v21  ;;  %v1997_v52 = vpop.eup %1996 }
  0xf6   : > { %v784_v27 = vmul.f32 %v1993_v32, %v697_v12  ;;  %v822_v41 = vmul.f32 %v1995_v57, %v2406_v31  ;;  %v785_v1 = vmul.f32 %v1993_v32, %v699_v37  ;;  %v2547_v42 = vadd.f32 1e-05, %v526_v60 }
  0xf7   : > { %v2530_v16 = vpop.f32.mrb[8].mxu0  ;;  %v844_v35 = vmul.f32 %v2390_v24, %v814_v61  ;;  %v845_v43 = vmul.f32 %v2396_v26, %v814_v61  ;;  %v548_v20 = vadd.f32 1e-05, %v532_v30  ;;  %v501_v47 = vmul.f32 0.12115067, %v469_v15 }
  0xf8   : > { %v2532_v22 = vpop.f32.mrb[8].mxu1  ;;  %v2543_v36 = vpop.f32.mrb[9].mxu0  ;;  %v800_v13 = vmul.f32 %v1995_v57, %v745_v29  ;;  %v1045_v12 = vadd.f32 %v1014_v5, %v1013_v11  ;;  %v541_v31 = vadd.f32 1e-05, %v525_v4  ;;  %v801_v32 = vmul.f32 %v1995_v57, %v747_v49 }
  0xf9   : > { %v2545_v7 = vpop.f32.mrb[9].mxu1  ;;  %976 = vadd.xlane.f32.xlu1 %v975_v23  ;;  %v846_v37 = vmul.f32 %v2390_v24, %v815_v3  ;;  %v847_v10 = vmul.f32 %v2396_v26, %v815_v3  ;;  %v470_v60 = vmul.f32 0.0625, %v454_v40  ;;  %v876_v0 = vsub.f32 %v784_v27, %v844_v35 }
  0xfa   : > { %v860_v61 = vmul.f32 %v2390_v24, %v822_v41  ;;  %v877_v23 = vsub.f32 %v785_v1, %v845_v43  ;;  %1046 = vadd.xlane.f32.xlu0 %v1045_v12  ;;  %v861_v49 = vmul.f32 %v2396_v26, %v822_v41  ;;  %v786_v57 = vmul.f32 %v2481_v25, %v703_v9 }
  0xfb   : > { %v2553_v34 = vpop.f32.mrb[10].mxu0  ;;  %v787_v4 = vmul.f32 %v2481_v25, %v705_v53  ;;  %v1015_v15 = vmul.f32 %v2494_v6, %v2494_v6  ;;  %2004 = vrsqrt.f32 %v548_v20  ;;  %v533_v3 = vsub.f32 %v501_v47, %v517_v18 }
  0xfc   : > { %v2555_v21 = vpop.f32.mrb[10].mxu1  ;;  %v2558_v30 = vpop.f32.mrb[11].mxu0  ;;  %v892_v11 = vsub.f32 %v800_v13, %v860_v61  ;;  %v823_v5 = vmul.f32 %v1997_v52, %v2415_v44  ;;  %v893_v1 = vsub.f32 %v801_v32, %v861_v49  ;;  %v1016_v40 = vmul.f32 %v2497_v17, %v2497_v17 }
  0xfd   : > { %v2560_v29 = vpop.f32.mrb[11].mxu1  ;;  %v1999_v27 = vpop.eup %1998  ;;  %v1029_v41 = vmul.f32 %v2488_v58, %v2488_v58  ;;  %v1030_v9 = vmul.f32 %v2491_v62, %v2491_v62  ;;  %v2579_v18 = vadd.f32 %v2409_v38, %v876_v0  ;;  %v2582_v44 = vadd.f32 %v2419_v48, %v877_v23 }
  0xfe   : > { %v2001_v35 = vpop.eup %2000  ;;  %v802_v43 = vmul.f32 %v1997_v52, %v2510_v14  ;;  %v803_v20 = vmul.f32 %v1997_v52, %v2523_v54  ;;  %v878_v12 = vsub.f32 %v786_v57, %v846_v37  ;;  %v879_v32 = vsub.f32 %v787_v4, %v847_v10 }
  0xff   : > { %v2574_v25 = vpop.f32.mrb[12].mxu0  ;;  %v1048_v61 = vadd.f32 %v1016_v40, %v1015_v15  ;;  %v1069_v49 = vadd.f32 %v1030_v9, %v1029_v41  ;;  %v502_v62 = vmul.f32 0.12115067, %v470_v60  ;;  %v862_v58 = vmul.f32 %v2390_v24, %v823_v5  ;;  %v2003_v17 = vpop.eup %2002 }
 0x100   : > { %v2576_v53 = vpop.f32.mrb[12].mxu1  ;;  %v2586_v47 = vpop.f32.mrb[13].mxu0  ;;  %v863_v0 = vmul.f32 %v2396_v26, %v823_v5  ;;  %v816_v23 = vmul.f32 %v1999_v27, %v2411_v39  ;;  %v549_v6 = vadd.f32 1e-05, %v533_v3  ;;  %v824_v14 = vmul.f32 %v2001_v35, %v2425_v50 }
 0x101   : > { %v2588_v13 = vpop.f32.mrb[13].mxu1  ;;  %1049 = vadd.xlane.f32.xlu1 %v1048_v61  ;;  %1070 = vadd.xlane.f32.xlu0 %v1069_v49  ;;  %v1031_v54 = vmul.f32 %v2505_v46, %v2505_v46  ;;  %v1032_v52 = vmul.f32 %v2508_v8, %v2508_v8  ;;  %v2603_v60 = vadd.f32 %v2409_v38, %v892_v11  ;;  %2006 = vrsqrt.f32 %v541_v31 }
 0x102   : > { %v2606_v39 = vadd.f32 %v2419_v48, %v893_v1  ;;  %v894_v57 = vsub.f32 %v802_v43, %v862_v58  ;;  %v895_v50 = vsub.f32 %v803_v20, %v863_v0  ;;  %v2613_v3 = vadd.f32 %v2409_v38, %v878_v12 }
 0x103   : > { %v2598_v37 = vpop.f32.mrb[14].mxu0  ;;  %v2616_v5 = vadd.f32 %v2419_v48, %v879_v32  ;;  %v1072_v40 = vadd.f32 %v1032_v52, %v1031_v54  ;;  %v954_v11 = vadd.f32 %v2582_v44, %v2579_v18  ;;  %v817_v1 = vmul.f32 %v2003_v17, %v2403_v28 }
 0x104   : > { %v2600_v10 = vpop.f32.mrb[14].mxu1  ;;  %v2608_v4 = vpop.f32.mrb[15].mxu0  ;;  %2008 = vrsqrt.f32 %v2547_v42  ;;  %v534_v58 = vsub.f32 %v502_v62, %v2518_v51  ;;  %v788_v41 = vmul.f32 %v1999_v27, %v2530_v16  ;;  %v789_v9 = vmul.f32 %v1999_v27, %v2543_v36 }
 0x105   : > { %v2610_v15 = vpop.f32.mrb[15].mxu1  ;;  %1073 = vadd.xlane.f32.xlu1 %v1072_v40  ;;  %955 = vadd.xlane.f32.xlu0 %v954_v11  ;;  %v2005_v43 = vpop.eup %2004  ;;  %v2626_v20 = vadd.f32 %v2409_v38, %v894_v57  ;;  %v2629_v12 = vadd.f32 %v2419_v48, %v895_v50  ;;  %v848_v31 = vmul.f32 %v2390_v24, %v816_v23  ;;  %2010 = vrsqrt.f32 %v549_v6 }
 0x106   : > { %v849_v28 = vmul.f32 %v2396_v26, %v816_v23  ;;  %v864_v62 = vmul.f32 %v2390_v24, %v824_v14  ;;  %v957_v51 = vadd.f32 %v2616_v5, %v2613_v3  ;;  %v978_v16 = vadd.f32 %v2606_v39, %v2603_v60 }
 0x107   : > { %v804_v36 = vmul.f32 %v2001_v35, %v2532_v22  ;;  %v805_v42 = vmul.f32 %v2001_v35, %v2545_v7  ;;  %v865_v27 = vmul.f32 %v2396_v26, %v824_v14  ;;  %v1017_v32 = vmul.f32 %v2579_v18, %v2579_v18 }
 0x108   : > { %v550_v61 = vadd.f32 1e-05, %v534_v58  ;;  %v880_v49 = vsub.f32 %v788_v41, %v848_v31  ;;  %v881_v6 = vsub.f32 %v789_v9, %v849_v28  ;;  %v1018_v0 = vmul.f32 %v2582_v44, %v2582_v44 }
 0x109   : > { %958 = vadd.xlane.f32.xlu1 %v957_v51  ;;  %979 = vadd.xlane.f32.xlu0 %v978_v16  ;;  %v790_v23 = vmul.f32 %v2003_v17, %v2553_v34  ;;  %v791_v54 = vmul.f32 %v2003_v17, %v2558_v30  ;;  %v981_v22 = vadd.f32 %v2629_v12, %v2626_v20 }
 0x10a   : > { %v1019_v7 = vmul.f32 %v2613_v3, %v2613_v3  ;;  %v1051_v35 = vadd.f32 %v1018_v0, %v1017_v32  ;;  %v1020_v14 = vmul.f32 %v2616_v5, %v2616_v5  ;;  %v1033_v52 = vmul.f32 %v2603_v60, %v2603_v60 }
 0x10b   : > { %v1034_v57 = vmul.f32 %v2606_v39, %v2606_v39  ;;  %v896_v50 = vsub.f32 %v804_v36, %v864_v62  ;;  %v850_v34 = vmul.f32 %v2390_v24, %v817_v1  ;;  %v825_v17 = vmul.f32 %v2005_v43, %v2443_v59  ;;  %v2007_v41 = vpop.eup %2006 }
 0x10c   : > { %v851_v30 = vmul.f32 %v2396_v26, %v817_v1  ;;  %2012 = vrsqrt.f32 %v550_v61  ;;  %v2661_v40 = vadd.f32 %v2409_v38, %v880_v49  ;;  %v897_v11 = vsub.f32 %v805_v42, %v865_v27 }
 0x10d   : > { %v806_v58 = vmul.f32 %v2005_v43, %v2555_v21  ;;  %982 = vadd.xlane.f32.xlu1 %v981_v22  ;;  %1052 = vadd.xlane.f32.xlu0 %v1051_v35  ;;  %v2665_v9 = vadd.f32 %v2419_v48, %v881_v6  ;;  %v882_v31 = vsub.f32 %v790_v23, %v850_v34 }
 0x10e   : > { %v883_v28 = vsub.f32 %v791_v54, %v851_v30  ;;  %v807_v62 = vmul.f32 %v2005_v43, %v2560_v29  ;;  %v2009_v59 = vpop.eup %2008  ;;  %v1054_v51 = vadd.f32 %v1020_v14, %v1019_v7  ;;  %v1075_v1 = vadd.f32 %v1034_v57, %v1033_v52 }
 0x10f   : > { %v1035_v16 = vmul.f32 %v2626_v20, %v2626_v20  ;;  %v1036_v36 = vmul.f32 %v2629_v12, %v2629_v12  ;;  %v866_v21 = vmul.f32 %v2390_v24, %v825_v17  ;;  %v867_v42 = vmul.f32 %v2396_v26, %v825_v17  ;;  %v2011_v27 = vpop.eup %2010 }
 0x110   : > { %v818_v32 = vmul.f32 %v2007_v41, %v2439_v56  ;;  %v2676_v29 = vadd.f32 %v2409_v38, %v896_v50  ;;  %v2679_v43 = vadd.f32 %v2419_v48, %v897_v11  ;;  %v2682_v6 = vadd.f32 %v2409_v38, %v882_v31 }
 0x111   : > { %1055 = vadd.xlane.f32.xlu1 %v1054_v51  ;;  %1076 = vadd.xlane.f32.xlu0 %v1075_v1  ;;  %v898_v61 = vsub.f32 %v806_v58, %v866_v21  ;;  %v899_v49 = vsub.f32 %v807_v62, %v867_v42  ;;  %v2685_v0 = vadd.f32 %v2419_v48, %v883_v28 }
 0x112   : > { %v1078_v23 = vadd.f32 %v1036_v36, %v1035_v16  ;;  %v960_v56 = vadd.f32 %v2665_v9, %v2661_v40  ;;  %v792_v54 = vmul.f32 %v2007_v41, %v2574_v25  ;;  %v819_v22 = vmul.f32 %v2009_v59, %v2437_v55 }
 0x113   : > { %v826_v7 = vmul.f32 %v2011_v27, %v2521_v19  ;;  %v793_v35 = vmul.f32 %v2007_v41, %v2586_v47  ;;  %v2694_v14 = vadd.f32 %v2409_v38, %v898_v61  ;;  %v2697_v52 = vadd.f32 %v2419_v48, %v899_v49 }
 0x114   : > { %v852_v57 = vmul.f32 %v2390_v24, %v818_v32  ;;  %v853_v50 = vmul.f32 %v2396_v26, %v818_v32  ;;  %v963_v55 = vadd.f32 %v2685_v0, %v2682_v6  ;;  %v984_v19 = vadd.f32 %v2679_v43, %v2676_v29 }
 0x115   : > { %1079 = vadd.xlane.f32.xlu1 %v1078_v23  ;;  %961 = vadd.xlane.f32.xlu0 %v960_v56  ;;  %v1021_v25 = vmul.f32 %v2661_v40, %v2661_v40  ;;  %v1022_v47 = vmul.f32 %v2665_v9, %v2665_v9  ;;  %v808_v30 = vmul.f32 %v2011_v27, %v2576_v53 }
 0x116   : > { %v2013_v34 = vpop.eup %2012  ;;  %v884_v17 = vsub.f32 %v792_v54, %v852_v57  ;;  %v854_v11 = vmul.f32 %v2390_v24, %v819_v22  ;;  %v868_v58 = vmul.f32 %v2390_v24, %v826_v7  ;;  %v885_v41 = vsub.f32 %v793_v35, %v853_v50 }
 0x117   : > { %v809_v31 = vmul.f32 %v2011_v27, %v2588_v13  ;;  %v794_v28 = vmul.f32 %v2009_v59, %v2598_v37  ;;  %v795_v62 = vmul.f32 %v2009_v59, %v2608_v4  ;;  %v987_v51 = vadd.f32 %v2697_v52, %v2694_v14 }
 0x118   : > { %v1023_v1 = vmul.f32 %v2682_v6, %v2682_v6  ;;  %v1057_v53 = vadd.f32 %v1022_v47, %v1021_v25  ;;  %v1024_v16 = vmul.f32 %v2685_v0, %v2685_v0  ;;  %v1037_v36 = vmul.f32 %v2676_v29, %v2676_v29 }
 0x119   : > { %964 = vadd.xlane.f32.xlu1 %v963_v55  ;;  %985 = vadd.xlane.f32.xlu0 %v984_v19  ;;  %v1038_v13 = vmul.f32 %v2679_v43, %v2679_v43  ;;  %v2726_v37 = vadd.f32 %v2409_v38, %v884_v17  ;;  %v869_v4 = vmul.f32 %v2396_v26, %v826_v7 }
 0x11a   : > { %v827_v59 = vmul.f32 %v2013_v34, %v2450_v2  ;;  %v855_v21 = vmul.f32 %v2396_v26, %v819_v22  ;;  %v900_v42 = vsub.f32 %v808_v30, %v868_v58  ;;  %v2732_v27 = vadd.f32 %v2419_v48, %v885_v41 }
 0x11b   : > { %v810_v32 = vmul.f32 %v2013_v34, %v2600_v10  ;;  %v901_v61 = vsub.f32 %v809_v31, %v869_v4  ;;  %v886_v49 = vsub.f32 %v794_v28, %v854_v11  ;;  %v811_v56 = vmul.f32 %v2013_v34, %v2610_v15 }
 0x11c   : > { %v887_v23 = vsub.f32 %v795_v62, %v855_v21  ;;  %v1060_v54 = vadd.f32 %v1024_v16, %v1023_v1  ;;  %v1081_v35 = vadd.f32 %v1038_v13, %v1037_v36  ;;  %v1039_v2 = vmul.f32 %v2694_v14, %v2694_v14 }
 0x11d   : > { %988 = vadd.xlane.f32.xlu1 %v987_v51  ;;  %1058 = vadd.xlane.f32.xlu0 %v1057_v53  ;;  %v1040_v22 = vmul.f32 %v2697_v52, %v2697_v52  ;;  %v870_v7 = vmul.f32 %v2390_v24, %v827_v59  ;;  %v871_v57 = vmul.f32 %v2396_v26, %v827_v59 }
 0x11e   : > { %v2743_v10 = vadd.f32 %v2409_v38, %v900_v42  ;;  %v2746_v50 = vadd.f32 %v2419_v48, %v901_v61  ;;  %v2749_v55 = vadd.f32 %v2409_v38, %v886_v49  ;;  %v2752_v19 = vadd.f32 %v2419_v48, %v887_v23 }
 0x11f   : > { %v902_v15 = vsub.f32 %v810_v32, %v870_v7  ;;  %v903_v34 = vsub.f32 %v811_v56, %v871_v57  ;;  %v1084_v25 = vadd.f32 %v1040_v22, %v1039_v2  ;;  %v966_v24 = vadd.f32 %v2732_v27, %v2726_v37 }
 0x120   : > { %v969_v17 = vadd.f32 %v2752_v19, %v2749_v55  ;;  %v990_v30 = vadd.f32 %v2746_v50, %v2743_v10  ;;  %v1025_v11 = vmul.f32 %v2726_v37, %v2726_v37  ;;  %v1026_v58 = vmul.f32 %v2732_v27, %v2732_v27 }
 0x121   : > { %1061 = vadd.xlane.f32.xlu1 %v1060_v54  ;;  %1082 = vadd.xlane.f32.xlu0 %v1081_v35  ;;  %v2757_v26 = vadd.f32 %v2409_v38, %v902_v15  ;;  %v2760_v47 = vadd.f32 %v2419_v48, %v903_v34  ;;  %v1027_v48 = vmul.f32 %v2749_v55, %v2749_v55 }
 0x122   : > { %v1063_v41 = vadd.f32 %v1026_v58, %v1025_v11  ;;  %v1028_v31 = vmul.f32 %v2752_v19, %v2752_v19  ;;  %v1041_v28 = vmul.f32 %v2743_v10, %v2743_v10  ;;  %v1042_v62 = vmul.f32 %v2746_v50, %v2746_v50 }
 0x123   : > { %v993_v38 = vadd.f32 %v2760_v47, %v2757_v26  ;;  %v1043_v53 = vmul.f32 %v2757_v26, %v2757_v26  ;;  %v1044_v16 = vmul.f32 %v2760_v47, %v2760_v47 }
 0x124   : > { %v1066_v51 = vadd.f32 %v1028_v31, %v1027_v48  ;;  %v1087_v1 = vadd.f32 %v1042_v62, %v1041_v28  ;;  %v1237_v28 = vld [vmem:[%s3400_s4] sm:$0x3] }
 0x125   : > { %1085 = vadd.xlane.f32.xlu1 %v1084_v25  ;;  %967 = vadd.xlane.f32.xlu0 %v966_v24  ;;  %v1090_v36 = vadd.f32 %v1044_v16, %v1043_v53 }
 0x129   : > { %970 = vadd.xlane.f32.xlu1 %v969_v17  ;;  %991 = vadd.xlane.f32.xlu0 %v990_v30 }
 0x12d   : > { %994 = vadd.xlane.f32.xlu1 %v993_v38  ;;  %1064 = vadd.xlane.f32.xlu0 %v1063_v41 }
 0x131   : > { %1067 = vadd.xlane.f32.xlu1 %v1066_v51  ;;  %1088 = vadd.xlane.f32.xlu0 %v1087_v1 }
 0x135   : > { %1091 = vadd.xlane.f32.xlu1 %v1090_v36 }
 0x17e   : > { %v950_v13 = vpop.xlane.xlu0 %949 }
 0x17f   : > { %v997_v21 = vmul.f32 0.00390625, %v950_v13  ;;  %v2803_v13 = vrot.slane %v1237_v28, %v2377_v63 }
 0x181   : > { %v1109_v61 = vmul.f32 %v997_v21, %v997_v21  ;;  %v1141_v36 = vsub.f32 %v2473_v45, %v997_v21 }
 0x182   : > { %v974_v4 = vpop.xlane.xlu0 %973  ;;  %v953_v59 = vpop.xlane.xlu1 %952 }
 0x183   : > { %v2784_v23 = vmul.f32 0.00390625, %v953_v59  ;;  %v2786_v54 = vmul.f32 0.00390625, %v974_v4  ;;  %v1142_v4 = vsub.f32 %v2476_v33, %v997_v21  ;;  %v3416_v33 = vld [vmem:[#allocation5_spill] sm:$0xff] }
 0x185   : > { %v1110_v2 = vmul.f32 %v2784_v23, %v2784_v23  ;;  %v1117_v34 = vmul.f32 %v2786_v54, %v2786_v54  ;;  %v1143_v21 = vsub.f32 %v3416_v33, %v2784_v23 }
 0x186   : > { %v977_v32 = vpop.xlane.xlu1 %976 }
 0x187   : > { %v1047_v42 = vpop.xlane.xlu0 %1046  ;;  %v2790_v57 = vmul.f32 0.00390625, %v977_v32 }
 0x188   : > { %v1093_v49 = vmul.f32 0.00390625, %v1047_v42 }
 0x189   : > { %v1118_v48 = vmul.f32 %v2790_v57, %v2790_v57 }
 0x18a   : > { %v1125_v56 = vsub.f32 %v1093_v49, %v1109_v61 }
 0x18c   : > { %v1173_v35 = vadd.f32 1e-05, %v1125_v56  ;;  %v3415_v56 = vld [vmem:[#allocation2_spill] sm:$0xff] }
 0x18e   : > { %2014 = vrsqrt.f32 %v1173_v35  ;;  %v1050_v22 = vpop.xlane.xlu1 %1049  ;;  %v1071_v7 = vpop.xlane.xlu0 %1070  ;;  %v2811_v35 = vrot.slane %v1237_v28, %v3415_v56 }
 0x18f   : > { %v1094_v15 = vmul.f32 0.00390625, %v1050_v22  ;;  %v1101_v25 = vmul.f32 0.00390625, %v1071_v7  ;;  %v3417_v7 = vld [vmem:[#allocation6_spill] sm:$0xff] }
 0x191   : > { %v1126_v24 = vsub.f32 %v1094_v15, %v1110_v2  ;;  %v1133_v17 = vsub.f32 %v1101_v25, %v1117_v34  ;;  %v1144_v15 = vsub.f32 %v3417_v7, %v2784_v23  ;;  %v3418_v34 = vld [vmem:[#allocation3_spill] sm:$0xff] }
 0x192   : > { %v1074_v30 = vpop.xlane.xlu1 %1073  ;;  %v956_v11 = vpop.xlane.xlu0 %955  ;;  %v1157_v25 = vsub.f32 %v3418_v34, %v2786_v54 }
 0x193   : > { %v1174_v58 = vadd.f32 1e-05, %v1126_v24  ;;  %v1181_v38 = vadd.f32 1e-05, %v1133_v17  ;;  %v1102_v41 = vmul.f32 0.00390625, %v1074_v30  ;;  %v2799_v53 = vmul.f32 0.00390625, %v956_v11 }
 0x194   : > { %v3419_v17 = vld [vmem:[#allocation4_spill] sm:$0xff] }
 0x195   : > { %2016 = vrsqrt.f32 %v1174_v58  ;;  %v1134_v31 = vsub.f32 %v1102_v41, %v1118_v48  ;;  %v1111_v2 = vmul.f32 %v2799_v53, %v2799_v53  ;;  %v1158_v30 = vsub.f32 %v3419_v17, %v2786_v54 }
 0x196   : > { %2018 = vrsqrt.f32 %v1181_v38  ;;  %v959_v62 = vpop.xlane.xlu1 %958  ;;  %v980_v51 = vpop.xlane.xlu0 %979  ;;  %v1159_v54 = vsub.f32 %v2505_v46, %v2790_v57 }
 0x197   : > { %v1182_v1 = vadd.f32 1e-05, %v1134_v31  ;;  %v2806_v59 = vmul.f32 0.00390625, %v959_v62  ;;  %v2808_v42 = vmul.f32 0.00390625, %v980_v51 }
 0x198   : > { %v2015_v16 = vpop.eup %2014 }
 0x199   : > { %2020 = vrsqrt.f32 %v1182_v1  ;;  %v1205_v49 = vmul.f32 %v2015_v16, %v1141_v36  ;;  %v1206_v22 = vmul.f32 %v2015_v16, %v1142_v4  ;;  %v1112_v11 = vmul.f32 %v2806_v59, %v2806_v59 }
 0x19a   : > { %v983_v32 = vpop.xlane.xlu1 %982  ;;  %v1053_v61 = vpop.xlane.xlu0 %1052  ;;  %v1119_v38 = vmul.f32 %v2808_v42, %v2808_v42 }
 0x19b   : > { %v1095_v45 = vmul.f32 0.00390625, %v1053_v61  ;;  %v1249_v63 = vmul.f32 %v2803_v13, %v1205_v49  ;;  %v1250_v41 = vmul.f32 %v2811_v35, %v1206_v22  ;;  %v2829_v28 = vmul.f32 0.00390625, %v983_v32 }
 0x19d   : > { %v1127_v24 = vsub.f32 %v1095_v45, %v1111_v2  ;;  %v2833_v16 = vadd.f32 %v1250_v41, %v1249_v63  ;;  %v1160_v2 = vsub.f32 %v2508_v8, %v2790_v57 }
 0x19e   : > { %v1056_v58 = vpop.xlane.xlu1 %1055  ;;  %v1077_v48 = vpop.xlane.xlu0 %1076 }
 0x19f   : > { %v2017_v31 = vpop.eup %2016  ;;  %v1175_v23 = vadd.f32 1e-05, %v1127_v24  ;;  %v1096_v62 = vmul.f32 0.00390625, %v1056_v58  ;;  %v1103_v51 = vmul.f32 0.00390625, %v1077_v48  ;;  %1313 = vrot.lane.b32.xlu0 %v2833_v16, %s2103_s26 }
 0x1a0   : > { %v2019_v1 = vpop.eup %2018  ;;  %v1207_v36 = vmul.f32 %v2017_v31, %v1143_v21  ;;  %v1208_v4 = vmul.f32 %v2017_v31, %v1144_v15  ;;  %v1120_v15 = vmul.f32 %v2829_v28, %v2829_v28 }
 0x1a1   : > { %2022 = vrsqrt.f32 %v1175_v23  ;;  %v1128_v61 = vsub.f32 %v1096_v62, %v1112_v11  ;;  %v1135_v49 = vsub.f32 %v1103_v51, %v1119_v38  ;;  %v1221_v56 = vmul.f32 %v2019_v1, %v1157_v25 }
 0x1a2   : > { %v1080_v32 = vpop.xlane.xlu1 %1079  ;;  %v962_v45 = vpop.xlane.xlu0 %961  ;;  %v1251_v22 = vmul.f32 %v2803_v13, %v1207_v36  ;;  %v1252_v46 = vmul.f32 %v2811_v35, %v1208_v4  ;;  %v1222_v63 = vmul.f32 %v2019_v1, %v1158_v30  ;;  %v1145_v62 = vsub.f32 %v2579_v18, %v2799_v53 }
 0x1a3   : > { %v2021_v33 = vpop.eup %2020  ;;  %v1176_v21 = vadd.f32 1e-05, %v1128_v61  ;;  %v1183_v7 = vadd.f32 1e-05, %v1135_v49  ;;  %v1104_v34 = vmul.f32 0.00390625, %v1080_v32  ;;  %v1265_v8 = vmul.f32 %v2803_v13, %v1221_v56 }
 0x1a4   : > { %v2843_v25 = vadd.f32 %v1252_v46, %v1251_v22  ;;  %v1266_v57 = vmul.f32 %v2811_v35, %v1222_v63  ;;  %v1223_v24 = vmul.f32 %v2021_v33, %v1159_v54  ;;  %v1224_v38 = vmul.f32 %v2021_v33, %v1160_v2 }
 0x1a5   : > { %2024 = vrsqrt.f32 %v1176_v21  ;;  %v1136_v17 = vsub.f32 %v1104_v34, %v1120_v15  ;;  %v2852_v31 = vmul.f32 0.00390625, %v962_v45  ;;  %v1146_v51 = vsub.f32 %v2582_v44, %v2799_v53 }
 0x1a6   : > { %2026 = vrsqrt.f32 %v1183_v7  ;;  %1315 = vrot.lane.b32.xlu1 %v2843_v25, %s2103_s26  ;;  %v965_v30 = vpop.xlane.xlu1 %964  ;;  %v2849_v11 = vadd.f32 %v1266_v57, %v1265_v8  ;;  %v986_v58 = vpop.xlane.xlu0 %985  ;;  %v1267_v48 = vmul.f32 %v2803_v13, %v1223_v24  ;;  %v1268_v23 = vmul.f32 %v2811_v35, %v1224_v38 }
 0x1a7   : > { %v1184_v41 = vadd.f32 1e-05, %v1136_v17  ;;  %v2861_v1 = vmul.f32 0.00390625, %v965_v30  ;;  %v2863_v54 = vmul.f32 0.00390625, %v986_v58  ;;  %v1113_v56 = vmul.f32 %v2852_v31, %v2852_v31 }
 0x1a8   : > { %1329 = vrot.lane.b32.xlu0 %v2849_v11, %s2103_s26  ;;  %v2865_v36 = vadd.f32 %v1268_v23, %v1267_v48  ;;  %v1147_v18 = vsub.f32 %v2613_v3, %v2806_v59  ;;  %v1148_v32 = vsub.f32 %v2616_v5, %v2806_v59  ;;  %v1161_v45 = vsub.f32 %v2603_v60, %v2808_v42 }
 0x1a9   : > { %2028 = vrsqrt.f32 %v1184_v41  ;;  %v1162_v22 = vsub.f32 %v2606_v39, %v2808_v42  ;;  %v1114_v63 = vmul.f32 %v2861_v1, %v2861_v1  ;;  %v1121_v3 = vmul.f32 %v2863_v54, %v2863_v54 }
 0x1aa   : > { %v989_v4 = vpop.xlane.xlu1 %988  ;;  %v1059_v61 = vpop.xlane.xlu0 %1058  ;;  %1331 = vrot.lane.b32.xlu1 %v2865_v36, %s2103_s26  ;;  %v1163_v42 = vsub.f32 %v2626_v20, %v2829_v28  ;;  %v1164_v48 = vsub.f32 %v2629_v12, %v2829_v28 }
 0x1ab   : > { %v2023_v49 = vpop.eup %2022  ;;  %v1097_v2 = vmul.f32 0.00390625, %v1059_v61  ;;  %v2885_v59 = vmul.f32 0.00390625, %v989_v4 }
 0x1ac   : > { %v1209_v44 = vmul.f32 %v2023_v49, %v1145_v62  ;;  %v1210_v53 = vmul.f32 %v2023_v49, %v1146_v51 }
 0x1ad   : > { %v1129_v46 = vsub.f32 %v1097_v2, %v1113_v56  ;;  %v1122_v56 = vmul.f32 %v2885_v59, %v2885_v59 }
 0x1ae   : > { %v1062_v33 = vpop.xlane.xlu1 %1061  ;;  %v1083_v21 = vpop.xlane.xlu0 %1082  ;;  %v1253_v7 = vmul.f32 %v2803_v13, %v1209_v44  ;;  %v1254_v15 = vmul.f32 %v2811_v35, %v1210_v53 }
 0x1af   : > { %v2025_v5 = vpop.eup %2024  ;;  %v1177_v60 = vadd.f32 1e-05, %v1129_v46  ;;  %v1098_v34 = vmul.f32 0.00390625, %v1062_v33  ;;  %v1105_v8 = vmul.f32 0.00390625, %v1083_v21 }
 0x1b0   : > { %v2027_v39 = vpop.eup %2026  ;;  %v2889_v57 = vadd.f32 %v1254_v15, %v1253_v7  ;;  %v1211_v24 = vmul.f32 %v2025_v5, %v1147_v18  ;;  %v1212_v17 = vmul.f32 %v2025_v5, %v1148_v32  ;;  %v1149_v7 = vsub.f32 %v2661_v40, %v2852_v31 }
 0x1b1   : > { %2030 = vrsqrt.f32 %v1177_v60  ;;  %v1130_v30 = vsub.f32 %v1098_v34, %v1114_v63  ;;  %v1137_v58 = vsub.f32 %v1105_v8, %v1121_v3  ;;  %v1225_v38 = vmul.f32 %v2027_v39, %v1161_v45 }
 0x1b2   : > { %v1086_v41 = vpop.xlane.xlu1 %1085  ;;  %1317 = vrot.lane.b32.xlu1 %v2889_v57, %s2103_s26  ;;  %v968_v23 = vpop.xlane.xlu0 %967  ;;  %v1255_v62 = vmul.f32 %v2803_v13, %v1211_v24  ;;  %v1256_v20 = vmul.f32 %v2811_v35, %v1212_v17  ;;  %v1226_v51 = vmul.f32 %v2027_v39, %v1162_v22  ;;  %v1150_v15 = vsub.f32 %v2665_v9, %v2852_v31 }
 0x1b3   : > { %v2029_v4 = vpop.eup %2028  ;;  %v1178_v61 = vadd.f32 1e-05, %v1130_v30  ;;  %v1185_v49 = vadd.f32 1e-05, %v1137_v58  ;;  %v1106_v2 = vmul.f32 0.00390625, %v1086_v41  ;;  %v1269_v12 = vmul.f32 %v2803_v13, %v1225_v38 }
 0x1b4   : > { %v2899_v18 = vadd.f32 %v1256_v20, %v1255_v62  ;;  %v1270_v28 = vmul.f32 %v2811_v35, %v1226_v51  ;;  %v1227_v44 = vmul.f32 %v2029_v4, %v1163_v42  ;;  %v1228_v46 = vmul.f32 %v2029_v4, %v1164_v48 }
 0x1b5   : > { %2032 = vrsqrt.f32 %v1178_v61  ;;  %v1138_v53 = vsub.f32 %v1106_v2, %v1122_v56  ;;  %v2908_v3 = vmul.f32 0.00390625, %v968_v23  ;;  %v1151_v30 = vsub.f32 %v2682_v6, %v2861_v1 }
 0x1b6   : > { %2034 = vrsqrt.f32 %v1185_v49  ;;  %v971_v32 = vpop.xlane.xlu1 %970  ;;  %1319 = vrot.lane.b32.xlu1 %v2899_v18, %s2103_s26  ;;  %v2905_v45 = vadd.f32 %v1270_v28, %v1269_v12  ;;  %v992_v22 = vpop.xlane.xlu0 %991  ;;  %v1271_v63 = vmul.f32 %v2803_v13, %v1227_v44  ;;  %v1272_v21 = vmul.f32 %v2811_v35, %v1228_v46 }
 0x1b7   : > { %v1186_v33 = vadd.f32 1e-05, %v1138_v53  ;;  %v2917_v5 = vmul.f32 0.00390625, %v971_v32  ;;  %v2921_v42 = vmul.f32 0.00390625, %v992_v22  ;;  %v1115_v24 = vmul.f32 %v2908_v3, %v2908_v3 }
 0x1b8   : > { %1333 = vrot.lane.b32.xlu0 %v2905_v45, %s2103_s26  ;;  %v2919_v34 = vadd.f32 %v1272_v21, %v1271_v63  ;;  %v1152_v40 = vsub.f32 %v2685_v0, %v2861_v1  ;;  %v1165_v58 = vsub.f32 %v2676_v29, %v2863_v54  ;;  %v1166_v38 = vsub.f32 %v2679_v43, %v2863_v54 }
 0x1b9   : > { %2036 = vrsqrt.f32 %v1186_v33  ;;  %v1167_v48 = vsub.f32 %v2694_v14, %v2885_v59  ;;  %v1116_v6 = vmul.f32 %v2917_v5, %v2917_v5  ;;  %v1123_v43 = vmul.f32 %v2921_v42, %v2921_v42 }
 0x1ba   : > { %v995_v60 = vpop.xlane.xlu1 %994  ;;  %v1065_v8 = vpop.xlane.xlu0 %1064  ;;  %1335 = vrot.lane.b32.xlu1 %v2919_v34, %s2103_s26  ;;  %v1168_v61 = vsub.f32 %v2697_v52, %v2885_v59 }
 0x1bb   : > { %v2031_v39 = vpop.eup %2030  ;;  %v1099_v17 = vmul.f32 0.00390625, %v1065_v8  ;;  %v2937_v23 = vmul.f32 0.00390625, %v995_v60 }
 0x1bc   : > { %v1213_v9 = vmul.f32 %v2031_v39, %v1149_v7  ;;  %v1214_v31 = vmul.f32 %v2031_v39, %v1150_v15 }
 0x1bd   : > { %v1131_v41 = vsub.f32 %v1099_v17, %v1115_v24  ;;  %v1124_v53 = vmul.f32 %v2937_v23, %v2937_v23 }
 0x1be   : > { %v1068_v0 = vpop.xlane.xlu1 %1067  ;;  %v1089_v1 = vpop.xlane.xlu0 %1088  ;;  %v1257_v62 = vmul.f32 %v2803_v13, %v1213_v9  ;;  %v1258_v20 = vmul.f32 %v2811_v35, %v1214_v31 }
 0x1bf   : > { %v2033_v51 = vpop.eup %2032  ;;  %v1179_v29 = vadd.f32 1e-05, %v1131_v41  ;;  %v1100_v4 = vmul.f32 0.00390625, %v1068_v0  ;;  %v1107_v54 = vmul.f32 0.00390625, %v1089_v1  ;;  %v1155_v0 = vsub.f32 %v2749_v55, %v2917_v5 }
 0x1c0   : > { %v2035_v14 = vpop.eup %2034  ;;  %v2947_v49 = vadd.f32 %v1258_v20, %v1257_v62  ;;  %v1215_v56 = vmul.f32 %v2033_v51, %v1151_v30  ;;  %v1216_v2 = vmul.f32 %v2033_v51, %v1152_v40  ;;  %v1156_v1 = vsub.f32 %v2752_v19, %v2917_v5 }
 0x1c1   : > { %2038 = vrsqrt.f32 %v1179_v29  ;;  %v1132_v12 = vsub.f32 %v1100_v4, %v1116_v6  ;;  %v1139_v28 = vsub.f32 %v1107_v54, %v1123_v43  ;;  %v1229_v44 = vmul.f32 %v2035_v14, %v1165_v58 }
 0x1c2   : > { %v1092_v32 = vpop.xlane.xlu1 %1091  ;;  %1321 = vrot.lane.b32.xlu0 %v2947_v49, %s2103_s26  ;;  %v1259_v22 = vmul.f32 %v2803_v13, %v1215_v56  ;;  %v1260_v46 = vmul.f32 %v2811_v35, %v1216_v2  ;;  %v1230_v52 = vmul.f32 %v2035_v14, %v1166_v38  ;;  %v1153_v58 = vsub.f32 %v2726_v37, %v2908_v3 }
 0x1c3   : > { %v2037_v59 = vpop.eup %2036  ;;  %v1180_v63 = vadd.f32 1e-05, %v1132_v12  ;;  %v1187_v33 = vadd.f32 1e-05, %v1139_v28  ;;  %v1108_v21 = vmul.f32 0.00390625, %v1092_v32  ;;  %v1273_v7 = vmul.f32 %v2803_v13, %v1229_v44 }
 0x1c4   : > { %v2956_v15 = vadd.f32 %v1260_v46, %v1259_v22  ;;  %v1274_v60 = vmul.f32 %v2811_v35, %v1230_v52  ;;  %v1231_v8 = vmul.f32 %v2037_v59, %v1167_v48  ;;  %v1232_v39 = vmul.f32 %v2037_v59, %v1168_v61 }
 0x1c5   : > { %2040 = vrsqrt.f32 %v1180_v63  ;;  %v1140_v24 = vsub.f32 %v1108_v21, %v1124_v53  ;;  %v1154_v38 = vsub.f32 %v2732_v27, %v2908_v3  ;;  %v1169_v27 = vsub.f32 %v2743_v10, %v2921_v42 }
 0x1c6   : > { %2042 = vrsqrt.f32 %v1187_v33  ;;  %1323 = vrot.lane.b32.xlu1 %v2956_v15, %s2103_s26  ;;  %v2961_v17 = vadd.f32 %v1274_v60, %v1273_v7  ;;  %v1275_v30 = vmul.f32 %v2803_v13, %v1231_v8  ;;  %v1276_v40 = vmul.f32 %v2811_v35, %v1232_v39 }
 0x1c7   : > { %v1188_v9 = vadd.f32 1e-05, %v1140_v24  ;;  %v1170_v3 = vsub.f32 %v2746_v50, %v2921_v42  ;;  %v1171_v19 = vsub.f32 %v2757_v26, %v2937_v23  ;;  %v1172_v5 = vsub.f32 %v2760_v47, %v2937_v23 }
 0x1c8   : > { %1337 = vrot.lane.b32.xlu0 %v2961_v17, %s2103_s26  ;;  %v2967_v31 = vadd.f32 %v1276_v40, %v1275_v30 }
 0x1c9   : > { %2044 = vrsqrt.f32 %v1188_v9 }
 0x1ca   : > { %1339 = vrot.lane.b32.xlu1 %v2967_v31, %s2103_s26 }
 0x1cb   : > { %v2039_v48 = vpop.eup %2038 }
 0x1cc   : > { %v1217_v41 = vmul.f32 %v2039_v48, %v1153_v58  ;;  %v1218_v6 = vmul.f32 %v2039_v48, %v1154_v38 }
 0x1ce   : > { %v1261_v62 = vmul.f32 %v2803_v13, %v1217_v41  ;;  %v1262_v20 = vmul.f32 %v2811_v35, %v1218_v6 }
 0x1cf   : > { %v2041_v37 = vpop.eup %2040 }
 0x1d0   : > { %v2043_v51 = vpop.eup %2042  ;;  %v1287_v29 = vadd.f32 %v1262_v20, %v1261_v62  ;;  %v1219_v4 = vmul.f32 %v2041_v37, %v1155_v0  ;;  %v1220_v43 = vmul.f32 %v2041_v37, %v1156_v1 }
 0x1d1   : > { %v1233_v54 = vmul.f32 %v2043_v51, %v1169_v27  ;;  %v1234_v55 = vmul.f32 %v2043_v51, %v1170_v3 }
 0x1d2   : > { %1325 = vrot.lane.b32.xlu0 %v1287_v29, %s2103_s26  ;;  %v1263_v14 = vmul.f32 %v2803_v13, %v1219_v4  ;;  %v1264_v10 = vmul.f32 %v2811_v35, %v1220_v43 }
 0x1d3   : > { %v2045_v61 = vpop.eup %2044  ;;  %v1277_v50 = vmul.f32 %v2803_v13, %v1233_v54  ;;  %v1278_v42 = vmul.f32 %v2811_v35, %v1234_v55 }
 0x1d4   : > { %v1288_v56 = vadd.f32 %v1264_v10, %v1263_v14  ;;  %v1235_v2 = vmul.f32 %v2045_v61, %v1171_v19  ;;  %v1236_v12 = vmul.f32 %v2045_v61, %v1172_v5 }
 0x1d5   : > { %v1295_v28 = vadd.f32 %v1278_v42, %v1277_v50 }
 0x1d6   : > { %1327 = vrot.lane.b32.xlu1 %v1288_v56, %s2103_s26  ;;  %v1279_v26 = vmul.f32 %v2803_v13, %v1235_v2  ;;  %v1280_v47 = vmul.f32 %v2811_v35, %v1236_v12 }
 0x1d7   : > { %1341 = vrot.lane.b32.xlu0 %v1295_v28, %s2103_s26 }
 0x1d8   : > { %v1296_v23 = vadd.f32 %v1280_v47, %v1279_v26 }
 0x1da   : > { %1343 = vrot.lane.b32.xlu1 %v1296_v23, %s2103_s26 }
 0x211   : > { %v1314_v44 = vpop.permute.xlu0 %1313 }
 0x212   : > { %v1361_v53 = vadd.f32 %v1314_v44, %v2833_v16  ;;  %v3079_v44 = vld [vmem:[%s3401_s5] ss:$0 sm:$0xff] }
 0x214   : > { %1393 = vrot.lane.b32.xlu0 %v1361_v53, %s2104_s28 }
 0x218   : > { %v1316_v32 = vpop.permute.xlu1 %1315 }
 0x219   : > { %v1362_v22 = vadd.f32 %v1316_v32, %v2843_v25 }
 0x21a   : > { %v1330_v46 = vpop.permute.xlu0 %1329 }
 0x21b   : > { %v1369_v52 = vadd.f32 %v1330_v46, %v2849_v11  ;;  %1395 = vrot.lane.b32.xlu1 %v1362_v22, %s2104_s28 }
 0x21c   : > { %v1332_v13 = vpop.permute.xlu1 %1331 }
 0x21d   : > { %1409 = vrot.lane.b32.xlu0 %v1369_v52, %s2104_s28  ;;  %v1370_v35 = vadd.f32 %v1332_v13, %v2865_v36 }
 0x21f   : > { %1411 = vrot.lane.b32.xlu1 %v1370_v35, %s2104_s28 }
 0x224   : > { %v1318_v59 = vpop.permute.xlu1 %1317 }
 0x225   : > { %v1363_v16 = vadd.f32 %v1318_v59, %v2889_v57 }
 0x227   : > { %1397 = vrot.lane.b32.xlu0 %v1363_v16, %s2104_s28 }
 0x228   : > { %v1320_v63 = vpop.permute.xlu1 %1319 }
 0x229   : > { %v1364_v25 = vadd.f32 %v1320_v63, %v2899_v18 }
 0x22a   : > { %v1334_v33 = vpop.permute.xlu0 %1333 }
 0x22b   : > { %v1371_v11 = vadd.f32 %v1334_v33, %v2905_v45  ;;  %1399 = vrot.lane.b32.xlu1 %v1364_v25, %s2104_s28 }
 0x22c   : > { %v1336_v21 = vpop.permute.xlu1 %1335 }
 0x22d   : > { %1413 = vrot.lane.b32.xlu0 %v1371_v11, %s2104_s28  ;;  %v1372_v36 = vadd.f32 %v1336_v21, %v2919_v34 }
 0x22f   : > { %1415 = vrot.lane.b32.xlu1 %v1372_v36, %s2104_s28 }
 0x234   : > { %v1322_v7 = vpop.permute.xlu0 %1321 }
 0x235   : > { %v1365_v57 = vadd.f32 %v1322_v7, %v2947_v49 }
 0x237   : > { %1401 = vrot.lane.b32.xlu0 %v1365_v57, %s2104_s28 }
 0x238   : > { %v1324_v60 = vpop.permute.xlu1 %1323 }
 0x239   : > { %v1366_v18 = vadd.f32 %v1324_v60, %v2956_v15 }
 0x23a   : > { %v1338_v8 = vpop.permute.xlu0 %1337 }
 0x23b   : > { %v1373_v45 = vadd.f32 %v1338_v8, %v2961_v17  ;;  %1403 = vrot.lane.b32.xlu1 %v1366_v18, %s2104_s28 }
 0x23c   : > { %v1340_v39 = vpop.permute.xlu1 %1339 }
 0x23d   : > { %1417 = vrot.lane.b32.xlu0 %v1373_v45, %s2104_s28  ;;  %v1374_v34 = vadd.f32 %v1340_v39, %v2967_v31 }
 0x23f   : > { %1419 = vrot.lane.b32.xlu1 %v1374_v34, %s2104_s28 }
 0x244   : > { %v1326_v24 = vpop.permute.xlu0 %1325 }
 0x245   : > { %v1367_v30 = vadd.f32 %v1326_v24, %v1287_v29 }
 0x247   : > { %1405 = vrot.lane.b32.xlu0 %v1367_v30, %s2104_s28 }
 0x248   : > { %v1328_v49 = vpop.permute.xlu1 %1327 }
 0x249   : > { %v1368_v40 = vadd.f32 %v1328_v49, %v1288_v56  ;;  %v1342_v9 = vpop.permute.xlu0 %1341 }
 0x24a   : > { %v1375_v15 = vadd.f32 %v1342_v9, %v1295_v28 }
 0x24b   : > { %1407 = vrot.lane.b32.xlu1 %v1368_v40, %s2104_s28 }
 0x24c   : > { %1421 = vrot.lane.b32.xlu0 %v1375_v15, %s2104_s28  ;;  %v1344_v17 = vpop.permute.xlu1 %1343 }
 0x24d   : > { %v1376_v58 = vadd.f32 %v1344_v17, %v1296_v23 }
 0x24f   : > { %1423 = vrot.lane.b32.xlu1 %v1376_v58, %s2104_s28 }
 0x286   : > { %v1394_v38 = vpop.permute.xlu0 %1393 }
 0x287   : > { %v1441_v31 = vadd.f32 %v1394_v38, %v1361_v53 }
 0x289   : > { %1473 = vrot.lane.b32.xlu0 %v1441_v31, %s2105_s29 }
 0x28d   : > { %v1396_v48 = vpop.permute.xlu1 %1395 }
 0x28e   : > { %v1442_v41 = vadd.f32 %v1396_v48, %v1362_v22 }
 0x28f   : > { %v1410_v6 = vpop.permute.xlu0 %1409 }
 0x290   : > { %v1449_v0 = vadd.f32 %v1410_v6, %v1369_v52  ;;  %1475 = vrot.lane.b32.xlu1 %v1442_v41, %s2105_s29 }
 0x291   : > { %v1412_v1 = vpop.permute.xlu1 %1411 }
 0x292   : > { %1489 = vrot.lane.b32.xlu0 %v1449_v0, %s2105_s29  ;;  %v1450_v62 = vadd.f32 %v1412_v1, %v1370_v35 }
 0x294   : > { %1491 = vrot.lane.b32.xlu1 %v1450_v62, %s2105_s29 }
 0x299   : > { %v1398_v20 = vpop.permute.xlu0 %1397 }
 0x29a   : > { %v1443_v37 = vadd.f32 %v1398_v20, %v1363_v16 }
 0x29c   : > { %1477 = vrot.lane.b32.xlu0 %v1443_v37, %s2105_s29 }
 0x29d   : > { %v1400_v27 = vpop.permute.xlu1 %1399 }
 0x29e   : > { %v3032_v3 = vadd.f32 %v1400_v27, %v1364_v25 }
 0x29f   : > { %v1414_v51 = vpop.permute.xlu0 %1413 }
 0x2a0   : > { %v3034_v29 = vadd.f32 %v1414_v51, %v1371_v11  ;;  %1479 = vrot.lane.b32.xlu1 %v3032_v3, %s2105_s29 }
 0x2a1   : > { %v1416_v4 = vpop.permute.xlu1 %1415 }
 0x2a2   : > { %1493 = vrot.lane.b32.xlu0 %v3034_v29, %s2105_s29  ;;  %v3040_v43 = vadd.f32 %v1416_v4, %v1372_v36 }
 0x2a4   : > { %1495 = vrot.lane.b32.xlu1 %v3040_v43, %s2105_s29 }
 0x2a9   : > { %v1402_v54 = vpop.permute.xlu0 %1401 }
 0x2aa   : > { %v3044_v55 = vadd.f32 %v1402_v54, %v1365_v57 }
 0x2ac   : > { %1481 = vrot.lane.b32.xlu0 %v3044_v55, %s2105_s29 }
 0x2ad   : > { %v1404_v19 = vpop.permute.xlu1 %1403 }
 0x2ae   : > { %v3048_v5 = vadd.f32 %v1404_v19, %v1366_v18 }
 0x2af   : > { %v1418_v14 = vpop.permute.xlu0 %1417 }
 0x2b0   : > { %v3050_v10 = vadd.f32 %v1418_v14, %v1373_v45  ;;  %1483 = vrot.lane.b32.xlu1 %v3048_v5, %s2105_s29 }
 0x2b1   : > { %v1420_v61 = vpop.permute.xlu1 %1419 }
 0x2b2   : > { %1497 = vrot.lane.b32.xlu0 %v3050_v10, %s2105_s29  ;;  %v3056_v50 = vadd.f32 %v1420_v61, %v1374_v34 }
 0x2b4   : > { %1499 = vrot.lane.b32.xlu1 %v3056_v50, %s2105_s29 }
 0x2b9   : > { %v1406_v42 = vpop.permute.xlu0 %1405 }
 0x2ba   : > { %v3060_v56 = vadd.f32 %v1406_v42, %v1367_v30 }
 0x2bc   : > { %1485 = vrot.lane.b32.xlu0 %v3060_v56, %s2105_s29 }
 0x2bd   : > { %v1408_v2 = vpop.permute.xlu1 %1407 }
 0x2be   : > { %v3064_v12 = vadd.f32 %v1408_v2, %v1368_v40  ;;  %v1422_v28 = vpop.permute.xlu0 %1421 }
 0x2bf   : > { %v3066_v26 = vadd.f32 %v1422_v28, %v1375_v15 }
 0x2c0   : > { %1487 = vrot.lane.b32.xlu1 %v3064_v12, %s2105_s29 }
 0x2c1   : > { %1501 = vrot.lane.b32.xlu0 %v3066_v26, %s2105_s29  ;;  %v1424_v47 = vpop.permute.xlu1 %1423 }
 0x2c2   : > { %v3072_v23 = vadd.f32 %v1424_v47, %v1376_v58 }
 0x2c4   : > { %1503 = vrot.lane.b32.xlu1 %v3072_v23, %s2105_s29 }
 0x2fb   : > { %v1474_v53 = vpop.permute.xlu0 %1473 }
 0x2fc   : > { %v1521_v32 = vadd.f32 %v1474_v53, %v1441_v31 }
 0x2fe   : > { %v3082_v22 = vadd.f32 %v3079_v44, %v1521_v32 }
 0x300   : > { %v1562_v13 = vsel %vm325_vm0, %v3082_v22, 0.0  ;;  %v1626_v36 = vmul.f32 %v3082_v22, %v3082_v22 }
 0x301   : > { %1563 = vadd.xlane.f32.xlu0 %v1562_v13 }
 0x302   : > { %v1476_v46 = vpop.permute.xlu1 %1475  ;;  %v1642_v60 = vsel %vm325_vm0, %v1626_v36, 0.0 }
 0x303   : > { %v1522_v52 = vadd.f32 %v1476_v46, %v1442_v41 }
 0x304   : > { %v1490_v35 = vpop.permute.xlu0 %1489 }
 0x305   : > { %v3087_v59 = vadd.f32 %v3079_v44, %v1522_v52  ;;  %v1529_v16 = vadd.f32 %v1490_v35, %v1449_v0 }
 0x306   : > { %v1492_v33 = vpop.permute.xlu1 %1491 }
 0x307   : > { %v3090_v63 = vadd.f32 %v3079_v44, %v1529_v16  ;;  %v1565_v25 = vsel %vm325_vm0, %v3087_v59, 0.0  ;;  %v1530_v11 = vadd.f32 %v1492_v33, %v1450_v62  ;;  %v1627_v18 = vmul.f32 %v3087_v59, %v3087_v59 }
 0x308   : > { %1566 = vadd.xlane.f32.xlu1 %v1565_v25 }
 0x309   : > { %v1586_v21 = vsel %vm325_vm0, %v3090_v63, 0.0  ;;  %v3099_v7 = vadd.f32 %v3079_v44, %v1530_v11  ;;  %v1634_v8 = vmul.f32 %v3090_v63, %v3090_v63  ;;  %v1645_v24 = vsel %vm325_vm0, %v1627_v18, 0.0 }
 0x30a   : > { %1587 = vadd.xlane.f32.xlu0 %v1586_v21 }
 0x30b   : > { %v1589_v57 = vsel %vm325_vm0, %v3099_v7, 0.0  ;;  %v1666_v30 = vsel %vm325_vm0, %v1634_v8, 0.0  ;;  %v1635_v49 = vmul.f32 %v3099_v7, %v3099_v7 }
 0x30c   : > { %1590 = vadd.xlane.f32.xlu1 %v1589_v57 }
 0x30d   : > { %v1669_v38 = vsel %vm325_vm0, %v1635_v49, 0.0 }
 0x30e   : > { %1643 = vadd.xlane.f32.xlu0 %v1642_v60  ;;  %v1478_v45 = vpop.permute.xlu0 %1477 }
 0x30f   : > { %v1523_v39 = vadd.f32 %v1478_v45, %v1443_v37 }
 0x310   : > { %1646 = vadd.xlane.f32.xlu1 %v1645_v24 }
 0x311   : > { %v3109_v34 = vadd.f32 %v3079_v44, %v1523_v39 }
 0x312   : > { %1667 = vadd.xlane.f32.xlu0 %v1666_v30  ;;  %v1480_v40 = vpop.permute.xlu1 %1479 }
 0x313   : > { %v1568_v9 = vsel %vm325_vm0, %v3109_v34, 0.0  ;;  %v1524_v17 = vadd.f32 %v1480_v40, %v3032_v3  ;;  %v1628_v1 = vmul.f32 %v3109_v34, %v3109_v34 }
 0x314   : > { %v1494_v15 = vpop.permute.xlu0 %1493  ;;  %1670 = vadd.xlane.f32.xlu1 %v1669_v38 }
 0x315   : > { %v1531_v58 = vadd.f32 %v1494_v15, %v3034_v29  ;;  %v3124_v41 = vadd.f32 %v3079_v44, %v1524_v17  ;;  %v1648_v37 = vsel %vm325_vm0, %v1628_v1, 0.0 }
 0x316   : > { %1569 = vadd.xlane.f32.xlu0 %v1568_v9  ;;  %v1496_v48 = vpop.permute.xlu1 %1495 }
 0x317   : > { %v3121_v31 = vadd.f32 %v3079_v44, %v1531_v58  ;;  %v1532_v6 = vadd.f32 %v1496_v48, %v3040_v43  ;;  %v1629_v27 = vmul.f32 %v3124_v41, %v3124_v41  ;;  %v1571_v42 = vsel %vm325_vm0, %v3124_v41, 0.0 }
 0x319   : > { %v1592_v0 = vsel %vm325_vm0, %v3121_v31, 0.0  ;;  %v3132_v62 = vadd.f32 %v3079_v44, %v1532_v6  ;;  %v1636_v3 = vmul.f32 %v3121_v31, %v3121_v31  ;;  %v1651_v4 = vsel %vm325_vm0, %v1629_v27, 0.0 }
 0x31a   : > { %1593 = vadd.xlane.f32.xlu0 %v1592_v0 }
 0x31b   : > { %v1595_v20 = vsel %vm325_vm0, %v3132_v62, 0.0  ;;  %v1672_v43 = vsel %vm325_vm0, %v1636_v3, 0.0  ;;  %v1637_v54 = vmul.f32 %v3132_v62, %v3132_v62 }
 0x31c   : > { %1596 = vadd.xlane.f32.xlu1 %v1595_v20 }
 0x31d   : > { %v1675_v47 = vsel %vm325_vm0, %v1637_v54, 0.0 }
 0x31e   : > { %1649 = vadd.xlane.f32.xlu0 %v1648_v37  ;;  %v1482_v51 = vpop.permute.xlu0 %1481 }
 0x31f   : > { %v1525_v29 = vadd.f32 %v1482_v51, %v3044_v55 }
 0x320   : > { %1652 = vadd.xlane.f32.xlu1 %v1651_v4 }
 0x321   : > { %v3150_v2 = vadd.f32 %v3079_v44, %v1525_v29 }
 0x322   : > { %1673 = vadd.xlane.f32.xlu0 %v1672_v43  ;;  %v1484_v19 = vpop.permute.xlu1 %1483 }
 0x323   : > { %v1526_v14 = vadd.f32 %v1484_v19, %v3048_v5  ;;  %v1574_v13 = vsel %vm325_vm0, %v3150_v2, 0.0  ;;  %v1630_v16 = vmul.f32 %v3150_v2, %v3150_v2 }
 0x324   : > { %v1498_v61 = vpop.permute.xlu0 %1497  ;;  %1676 = vadd.xlane.f32.xlu1 %v1675_v47 }
 0x325   : > { %v3153_v55 = vadd.f32 %v3079_v44, %v1526_v14  ;;  %v1533_v28 = vadd.f32 %v1498_v61, %v3050_v10  ;;  %v1654_v36 = vsel %vm325_vm0, %v1630_v16, 0.0 }
 0x326   : > { %1572 = vadd.xlane.f32.xlu0 %v1571_v42  ;;  %v1500_v53 = vpop.permute.xlu1 %1499 }
 0x327   : > { %v1534_v32 = vadd.f32 %v1500_v53, %v3056_v50  ;;  %v1577_v5 = vsel %vm325_vm0, %v3153_v55, 0.0  ;;  %v3161_v46 = vadd.f32 %v3079_v44, %v1533_v28  ;;  %v1631_v35 = vmul.f32 %v3153_v55, %v3153_v55 }
 0x328   : > { %1578 = vadd.xlane.f32.xlu1 %v1577_v5 }
 0x329   : > { %v3164_v52 = vadd.f32 %v3079_v44, %v1534_v32  ;;  %v1598_v50 = vsel %vm325_vm0, %v3161_v46, 0.0  ;;  %v1638_v33 = vmul.f32 %v3161_v46, %v3161_v46  ;;  %v1657_v21 = vsel %vm325_vm0, %v1631_v35, 0.0 }
 0x32a   : > { %1575 = vadd.xlane.f32.xlu0 %v1574_v13 }
 0x32b   : > { %v1601_v10 = vsel %vm325_vm0, %v3164_v52, 0.0  ;;  %v1639_v57 = vmul.f32 %v3164_v52, %v3164_v52  ;;  %v1678_v45 = vsel %vm325_vm0, %v1638_v33, 0.0 }
 0x32c   : > { %1602 = vadd.xlane.f32.xlu1 %v1601_v10 }
 0x32d   : > { %v1681_v30 = vsel %vm325_vm0, %v1639_v57, 0.0 }
 0x32e   : > { %1599 = vadd.xlane.f32.xlu0 %v1598_v50  ;;  %v1486_v25 = vpop.permute.xlu0 %1485 }
 0x32f   : > { %v1527_v11 = vadd.f32 %v1486_v25, %v3060_v56 }
 0x330   : > { %1658 = vadd.xlane.f32.xlu1 %v1657_v21 }
 0x331   : > { %v3186_v39 = vadd.f32 %v3079_v44, %v1527_v11 }
 0x332   : > { %1655 = vadd.xlane.f32.xlu0 %v1654_v36  ;;  %v1488_v60 = vpop.permute.xlu1 %1487 }
 0x333   : > { %v1528_v18 = vadd.f32 %v1488_v60, %v3064_v12  ;;  %v1502_v8 = vpop.permute.xlu0 %1501  ;;  %v1580_v17 = vsel %vm325_vm0, %v3186_v39, 0.0  ;;  %v1632_v38 = vmul.f32 %v3186_v39, %v3186_v39 }
 0x334   : > { %v1535_v24 = vadd.f32 %v1502_v8, %v3066_v26  ;;  %1682 = vadd.xlane.f32.xlu1 %v1681_v30 }
 0x335   : > { %v3189_v56 = vadd.f32 %v3079_v44, %v1528_v18  ;;  %v1660_v48 = vsel %vm325_vm0, %v1632_v38, 0.0 }
 0x336   : > { %1679 = vadd.xlane.f32.xlu0 %v1678_v45  ;;  %v1504_v49 = vpop.permute.xlu1 %1503  ;;  %v3197_v9 = vadd.f32 %v3079_v44, %v1535_v24 }
 0x337   : > { %v1536_v40 = vadd.f32 %v1504_v49, %v3072_v23  ;;  %v1583_v12 = vsel %vm325_vm0, %v3189_v56, 0.0  ;;  %v1633_v58 = vmul.f32 %v3189_v56, %v3189_v56 }
 0x338   : > { %1584 = vadd.xlane.f32.xlu1 %v1583_v12  ;;  %v1604_v23 = vsel %vm325_vm0, %v3197_v9, 0.0  ;;  %v1640_v0 = vmul.f32 %v3197_v9, %v3197_v9 }
 0x339   : > { %v3200_v15 = vadd.f32 %v3079_v44, %v1536_v40  ;;  %v1663_v44 = vsel %vm325_vm0, %v1633_v58, 0.0  ;;  %v3230_v40 = vld [vmem:[%s3402_s6] ss:$0 sm:$0xff] }
 0x33a   : > { %1581 = vadd.xlane.f32.xlu0 %v1580_v17  ;;  %v1684_v20 = vsel %vm325_vm0, %v1640_v0, 0.0 }
 0x33b   : > { %v1607_v26 = vsel %vm325_vm0, %v3200_v15, 0.0  ;;  %v1641_v6 = vmul.f32 %v3200_v15, %v3200_v15 }
 0x33c   : > { %1608 = vadd.xlane.f32.xlu1 %v1607_v26 }
 0x33d   : > { %v1687_v1 = vsel %vm325_vm0, %v1641_v6, 0.0 }
 0x33e   : > { %1605 = vadd.xlane.f32.xlu0 %v1604_v23 }
 0x340   : > { %1664 = vadd.xlane.f32.xlu1 %v1663_v44 }
 0x342   : > { %1661 = vadd.xlane.f32.xlu0 %v1660_v48 }
 0x344   : > { %1688 = vadd.xlane.f32.xlu1 %v1687_v1 }
 0x346   : > { %1685 = vadd.xlane.f32.xlu0 %v1684_v20 }
 0x38e   : > { %v1564_v37 = vpop.xlane.xlu0 %1563 }
 0x38f   : > { %v1610_v51 = vmul.f32 0.0625, %v1564_v37 }
 0x391   : > { %v1706_v19 = vmul.f32 %v1610_v51, %v1610_v51  ;;  %v1738_v45 = vsub.f32 %v3082_v22, %v1610_v51  ;;  %v3239_v22 = vld [vmem:[%s3403_s7] ss:$0 sm:$0xff] }
 0x395   : > { %v1567_v27 = vpop.xlane.xlu1 %1566 }
 0x396   : > { %v1611_v29 = vmul.f32 0.0625, %v1567_v27 }
 0x397   : > { %v1588_v3 = vpop.xlane.xlu0 %1587 }
 0x398   : > { %v1618_v4 = vmul.f32 0.0625, %v1588_v3  ;;  %v1707_v42 = vmul.f32 %v1611_v29, %v1611_v29  ;;  %v1739_v38 = vsub.f32 %v3087_v59, %v1611_v29 }
 0x399   : > { %v1591_v43 = vpop.xlane.xlu1 %1590 }
 0x39a   : > { %v1714_v28 = vmul.f32 %v1618_v4, %v1618_v4  ;;  %v3220_v32 = vmul.f32 0.0625, %v1591_v43  ;;  %v1746_v20 = vsub.f32 %v3090_v63, %v1618_v4  ;;  %v2078_v4 = vld [vmem:[%s2181_s19] sm:$0xff] }
 0x39b   : > { %v1644_v54 = vpop.xlane.xlu0 %1643 }
 0x39c   : > { %v1690_v14 = vmul.f32 0.0625, %v1644_v54  ;;  %v1715_v33 = vmul.f32 %v3220_v32, %v3220_v32  ;;  %v1747_v63 = vsub.f32 %v3099_v7, %v3220_v32 }
 0x39d   : > { %v1647_v47 = vpop.xlane.xlu1 %1646 }
 0x39e   : > { %v1722_v61 = vsub.f32 %v1690_v14, %v1706_v19  ;;  %v1691_v13 = vmul.f32 0.0625, %v1647_v47 }
 0x39f   : > { %v1668_v53 = vpop.xlane.xlu0 %1667 }
 0x3a0   : > { %v1754_v5 = vadd.f32 1e-05, %v1722_v61  ;;  %v1698_v10 = vmul.f32 0.0625, %v1668_v53  ;;  %v1723_v50 = vsub.f32 %v1691_v13, %v1707_v42 }
 0x3a1   : > { %v1671_v16 = vpop.xlane.xlu1 %1670 }
 0x3a2   : > { %2046 = vrsqrt.f32 %v1754_v5  ;;  %v1730_v35 = vsub.f32 %v1698_v10, %v1714_v28  ;;  %v1755_v11 = vadd.f32 1e-05, %v1723_v50  ;;  %v1699_v36 = vmul.f32 0.0625, %v1671_v16 }
 0x3a3   : > { %v1570_v25 = vpop.xlane.xlu0 %1569 }
 0x3a4   : > { %v1762_v21 = vadd.f32 1e-05, %v1730_v35  ;;  %2048 = vrsqrt.f32 %v1755_v11  ;;  %v1731_v57 = vsub.f32 %v1699_v36, %v1715_v33  ;;  %v3224_v8 = vmul.f32 0.0625, %v1570_v25  ;;  %v2079_v33 = vld [vmem:[%s2181_s19 + $0x8] sm:$0xff] }
 0x3a6   : > { %2050 = vrsqrt.f32 %v1762_v21  ;;  %v1763_v18 = vadd.f32 1e-05, %v1731_v57  ;;  %v1708_v12 = vmul.f32 %v3224_v8, %v3224_v8 }
 0x3a7   : > { %v1594_v60 = vpop.xlane.xlu0 %1593 }
 0x3a8   : > { %2052 = vrsqrt.f32 %v1763_v18  ;;  %v3234_v17 = vmul.f32 0.0625, %v1594_v60  ;;  %v2080_v60 = vld [vmem:[%s2181_s19 + $0x40] sm:$0xff] }
 0x3a9   : > { %v1597_v24 = vpop.xlane.xlu1 %1596 }
 0x3aa   : > { %v3243_v48 = vmul.f32 0.0625, %v1597_v24  ;;  %v1716_v37 = vmul.f32 %v3234_v17, %v3234_v17 }
 0x3ab   : > { %v1650_v30 = vpop.xlane.xlu0 %1649 }
 0x3ac   : > { %v2047_v49 = vpop.eup %2046  ;;  %v1692_v26 = vmul.f32 0.0625, %v1650_v30  ;;  %v1717_v61 = vmul.f32 %v3243_v48, %v3243_v48 }
 0x3ad   : > { %v1786_v23 = vmul.f32 %v2047_v49, %v1738_v45  ;;  %v1653_v6 = vpop.xlane.xlu1 %1652 }
 0x3ae   : > { %v1724_v58 = vsub.f32 %v1692_v26, %v1708_v12  ;;  %v2049_v1 = vpop.eup %2048  ;;  %v1693_v50 = vmul.f32 0.0625, %v1653_v6  ;;  %v2081_v12 = vld [vmem:[%s2181_s19 + $0x48] sm:$0xff] }
 0x3af   : > { %v1808_v44 = vmul.f32 %v3230_v40, %v1786_v23  ;;  %v1674_v0 = vpop.xlane.xlu0 %1673  ;;  %v1787_v54 = vmul.f32 %v2049_v1, %v1739_v38  ;;  %v1740_v23 = vsub.f32 %v3109_v34, %v3224_v8 }
 0x3b0   : > { %v1756_v27 = vadd.f32 1e-05, %v1724_v58  ;;  %v1700_v3 = vmul.f32 0.0625, %v1674_v0  ;;  %v2051_v51 = vpop.eup %2050 }
 0x3b1   : > { %v1830_v43 = vadd.f32 %v3239_v22, %v1808_v44  ;;  %v1794_v59 = vmul.f32 %v2051_v51, %v1746_v20  ;;  %v1809_v14 = vmul.f32 %v3230_v40, %v1787_v54  ;;  %v1677_v42 = vpop.xlane.xlu1 %1676  ;;  %v1748_v20 = vsub.f32 %v3121_v31, %v3234_v17 }
 0x3b2   : > { %2054 = vrsqrt.f32 %v1756_v27  ;;  %v1732_v29 = vsub.f32 %v1700_v3, %v1716_v37  ;;  %v2053_v47 = vpop.eup %2052  ;;  %v1701_v13 = vmul.f32 0.0625, %v1677_v42 }
 0x3b3   : > { %v1846_v19 = vadd.f32 %v2078_v4, %v1830_v43  ;;  %v1573_v28 = vpop.xlane.xlu0 %1572  ;;  %v1816_v53 = vmul.f32 %v3230_v40, %v1794_v59  ;;  %v1831_v7 = vadd.f32 %v3239_v22, %v1809_v14  ;;  %v1795_v32 = vmul.f32 %v2053_v47, %v1747_v63  ;;  %v2082_v14 = vld [vmem:[%s2181_s19 + $0x10] sm:$0xff] }
 0x3b4   : > { %v1764_v5 = vadd.f32 1e-05, %v1732_v29  ;;  %v3263_v10 = vmul.f32 0.0625, %v1573_v28  ;;  %v1733_v16 = vsub.f32 %v1701_v13, %v1717_v61  ;;  %v1749_v63 = vsub.f32 %v3132_v62, %v3243_v48 }
 0x3b5   : > { %1862 = vst.msk [vmem:[%s3254_s18] sm:$0xff] %vm325_vm0, %v1846_v19  ;;  %v1838_v35 = vadd.f32 %v3239_v22, %v1816_v53  ;;  %v1847_v11 = vadd.f32 %v2079_v33, %v1831_v7  ;;  %v1817_v21 = vmul.f32 %v3230_v40, %v1795_v32  ;;  %v1579_v36 = vpop.xlane.xlu1 %1578 }
 0x3b6   : > { %2056 = vrsqrt.f32 %v1764_v5  ;;  %v1709_v25 = vmul.f32 %v3263_v10, %v3263_v10  ;;  %v1765_v45 = vadd.f32 1e-05, %v1733_v16  ;;  %v3282_v6 = vmul.f32 0.0625, %v1579_v36 }
 0x3b7   : > { %v1576_v57 = vpop.xlane.xlu0 %1575  ;;  %v1854_v18 = vadd.f32 %v2080_v60, %v1838_v35  ;;  %1863 = vst.msk [vmem:[%s3254_s18 + $0x8] sm:$0xff] %vm325_vm0, %v1847_v11  ;;  %v1839_v30 = vadd.f32 %v3239_v22, %v1817_v21  ;;  %v1741_v16 = vsub.f32 %v3124_v41, %v3263_v10  ;;  %v2083_v21 = vld [vmem:[%s2181_s19 + $0x50] sm:$0xff] }
 0x3b8   : > { %v1725_v24 = vsub.f32 %v1693_v50, %v1709_v25  ;;  %2058 = vrsqrt.f32 %v1765_v45  ;;  %v3284_v0 = vmul.f32 0.0625, %v1576_v57  ;;  %v1711_v43 = vmul.f32 %v3282_v6, %v3282_v6 }
 0x3b9   : > { %1870 = vst.msk [vmem:[%s3254_s18 + $0x40] sm:$0xff] %vm325_vm0, %v1854_v18  ;;  %v1855_v26 = vadd.f32 %v2081_v12, %v1839_v30  ;;  %v1603_v58 = vpop.xlane.xlu1 %1602 }
 0x3ba   : > { %v1757_v49 = vadd.f32 1e-05, %v1725_v24  ;;  %v3291_v27 = vmul.f32 0.0625, %v1603_v58  ;;  %v1710_v54 = vmul.f32 %v3284_v0, %v3284_v0 }
 0x3bb   : > { %v1600_v38 = vpop.xlane.xlu0 %1599  ;;  %1871 = vst.msk [vmem:[%s3254_s18 + $0x48] sm:$0xff] %vm325_vm0, %v1855_v26 }
 0x3bc   : > { %v2055_v44 = vpop.eup %2054  ;;  %2060 = vrsqrt.f32 %v1757_v49  ;;  %v3293_v34 = vmul.f32 0.0625, %v1600_v38  ;;  %v1719_v28 = vmul.f32 %v3291_v27, %v3291_v27  ;;  %v2084_v49 = vld [vmem:[%s2181_s19 + $0x58] sm:$0xff] }
 0x3bd   : > { %v1788_v1 = vmul.f32 %v2055_v44, %v1740_v23  ;;  %v1659_v8 = vpop.xlane.xlu1 %1658 }
 0x3be   : > { %v1695_v59 = vmul.f32 0.0625, %v1659_v8  ;;  %v1718_v47 = vmul.f32 %v3293_v34, %v3293_v34  ;;  %v1742_v8 = vsub.f32 %v3150_v2, %v3284_v0  ;;  %v1751_v2 = vsub.f32 %v3164_v52, %v3291_v27 }
 0x3bf   : > { %v1810_v37 = vmul.f32 %v3230_v40, %v1788_v1  ;;  %v1656_v3 = vpop.xlane.xlu0 %1655  ;;  %v2085_v1 = vld [vmem:[%s2181_s19 + $0x18] sm:$0xff]  ;;  %v1750_v0 = vsub.f32 %v3161_v46, %v3293_v34 }
 0x3c0   : > { %v2057_v51 = vpop.eup %2056  ;;  %v1694_v29 = vmul.f32 0.0625, %v1656_v3  ;;  %v1727_v4 = vsub.f32 %v1695_v59, %v1711_v43 }
 0x3c1   : > { %v1832_v31 = vadd.f32 %v3239_v22, %v1810_v37  ;;  %v1796_v17 = vmul.f32 %v2057_v51, %v1748_v20  ;;  %v1683_v53 = vpop.xlane.xlu1 %1682  ;;  %v1743_v37 = vsub.f32 %v3153_v55, %v3282_v6 }
 0x3c2   : > { %v1726_v19 = vsub.f32 %v1694_v29, %v1710_v54  ;;  %v2059_v13 = vpop.eup %2058  ;;  %v1759_v7 = vadd.f32 1e-05, %v1727_v4  ;;  %v1703_v50 = vmul.f32 0.0625, %v1683_v53 }
 0x3c3   : > { %v1848_v61 = vadd.f32 %v2082_v14, %v1832_v31  ;;  %v1818_v42 = vmul.f32 %v3230_v40, %v1796_v17  ;;  %v1680_v5 = vpop.xlane.xlu0 %1679  ;;  %v1797_v35 = vmul.f32 %v2059_v13, %v1749_v63 }
 0x3c4   : > { %v1758_v32 = vadd.f32 1e-05, %v1726_v19  ;;  %v1702_v62 = vmul.f32 0.0625, %v1680_v5  ;;  %2062 = vrsqrt.f32 %v1759_v7  ;;  %v1735_v33 = vsub.f32 %v1703_v50, %v1719_v28 }
 0x3c5   : > { %1864 = vst.msk [vmem:[%s3254_s18 + $0x10] sm:$0xff] %vm325_vm0, %v1848_v61  ;;  %v1840_v48 = vadd.f32 %v3239_v22, %v1818_v42  ;;  %v1819_v57 = vmul.f32 %v3230_v40, %v1797_v35  ;;  %v1585_v18 = vpop.xlane.xlu1 %1584 }
 0x3c6   : > { %v2061_v25 = vpop.eup %2060  ;;  %v1734_v11 = vsub.f32 %v1702_v62, %v1718_v47  ;;  %2064 = vrsqrt.f32 %v1758_v32  ;;  %v1767_v24 = vadd.f32 1e-05, %v1735_v33  ;;  %v3321_v38 = vmul.f32 0.0625, %v1585_v18 }
 0x3c7   : > { %v1856_v36 = vadd.f32 %v2083_v21, %v1840_v48  ;;  %v1789_v60 = vmul.f32 %v2061_v25, %v1741_v16  ;;  %v1582_v45 = vpop.xlane.xlu0 %1581  ;;  %v1841_v41 = vadd.f32 %v3239_v22, %v1819_v57  ;;  %v2086_v16 = vld [vmem:[%s2181_s19 + $0x28] sm:$0xff]  ;;  %v2087_v21 = vld [vmem:[%s2181_s19 + $0x20] sm:$0xff] }
 0x3c8   : > { %v1766_v30 = vadd.f32 1e-05, %v1734_v11  ;;  %2066 = vrsqrt.f32 %v1767_v24  ;;  %v3323_v44 = vmul.f32 0.0625, %v1582_v45  ;;  %v1713_v59 = vmul.f32 %v3321_v38, %v3321_v38 }
 0x3c9   : > { %1872 = vst.msk [vmem:[%s3254_s18 + $0x50] sm:$0xff] %vm325_vm0, %v1856_v36  ;;  %v1811_v10 = vmul.f32 %v3230_v40, %v1789_v60  ;;  %v1857_v12 = vadd.f32 %v2084_v49, %v1841_v41  ;;  %v1609_v23 = vpop.xlane.xlu1 %1608 }
 0x3ca   : > { %2068 = vrsqrt.f32 %v1766_v30  ;;  %v3334_v3 = vmul.f32 0.0625, %v1609_v23  ;;  %v1712_v29 = vmul.f32 %v3323_v44, %v3323_v44  ;;  %v2088_v30 = vld [vmem:[%s2181_s19 + $0x68] sm:$0xff]  ;;  %v1744_v23 = vsub.f32 %v3186_v39, %v3323_v44 }
 0x3cb   : > { %v1833_v26 = vadd.f32 %v3239_v22, %v1811_v10  ;;  %v1606_v58 = vpop.xlane.xlu0 %1605  ;;  %1873 = vst.msk [vmem:[%s3254_s18 + $0x58] sm:$0xff] %vm325_vm0, %v1857_v12  ;;  %v2089_v10 = vld [vmem:[%s2181_s19 + $0x60] sm:$0xff]  ;;  %v1745_v12 = vsub.f32 %v3189_v56, %v3321_v38 }
 0x3cc   : > { %v1624_v19 = vmul.f32 0.0625, %v1606_v58  ;;  %v1721_v42 = vmul.f32 %v3334_v3, %v3334_v3 }
 0x3cd   : > { %v1849_v20 = vadd.f32 %v2085_v1, %v1833_v26  ;;  %v1665_v51 = vpop.xlane.xlu1 %1664 }
 0x3ce   : > { %v2063_v54 = vpop.eup %2062  ;;  %v1697_v31 = vmul.f32 0.0625, %v1665_v51  ;;  %v1720_v46 = vmul.f32 %v1624_v19, %v1624_v19 }
 0x3cf   : > { %1865 = vst.msk [vmem:[%s3254_s18 + $0x18] sm:$0xff] %vm325_vm0, %v1849_v20  ;;  %v1662_v43 = vpop.xlane.xlu0 %1661  ;;  %v1791_v4 = vmul.f32 %v2063_v54, %v1743_v37  ;;  %v1753_v37 = vsub.f32 %v3200_v15, %v3334_v3  ;;  %v2090_v15 = vld [vmem:[%s2181_s19 + $0x38] sm:$0xff] }
 0x3d0   : > { %v1696_v17 = vmul.f32 0.0625, %v1662_v43  ;;  %v2065_v63 = vpop.eup %2064  ;;  %v1729_v6 = vsub.f32 %v1697_v31, %v1713_v59  ;;  %v1752_v43 = vsub.f32 %v3197_v9, %v1624_v19  ;;  %v2091_v31 = vld [vmem:[%s2181_s19 + $0x30] sm:$0xff]  ;;  %v2092_v19 = vld [vmem:[%s2181_s19 + $0x78] sm:$0xff] }
 0x3d1   : > { %v1790_v55 = vmul.f32 %v2065_v63, %v1742_v8  ;;  %v1813_v61 = vmul.f32 %v3230_v40, %v1791_v4  ;;  %v1689_v28 = vpop.xlane.xlu1 %1688 }
 0x3d2   : > { %v1728_v14 = vsub.f32 %v1696_v17, %v1712_v29  ;;  %v2067_v53 = vpop.eup %2066  ;;  %v1761_v13 = vadd.f32 1e-05, %v1729_v6  ;;  %v1705_v32 = vmul.f32 0.0625, %v1689_v28  ;;  %v2093_v6 = vld [vmem:[%s2181_s19 + $0x70] sm:$0xff] }
 0x3d3   : > { %v1686_v47 = vpop.xlane.xlu0 %1685  ;;  %v1812_v5 = vmul.f32 %v3230_v40, %v1790_v55  ;;  %v1835_v52 = vadd.f32 %v3239_v22, %v1813_v61  ;;  %v1799_v27 = vmul.f32 %v2067_v53, %v1751_v2 }
 0x3d4   : > { %v1760_v7 = vadd.f32 1e-05, %v1728_v14  ;;  %v2069_v50 = vpop.eup %2068  ;;  %v1704_v34 = vmul.f32 0.0625, %v1686_v47  ;;  %2070 = vrsqrt.f32 %v1761_v13  ;;  %v1737_v35 = vsub.f32 %v1705_v32, %v1721_v42 }
 0x3d5   : > { %v1834_v62 = vadd.f32 %v3239_v22, %v1812_v5  ;;  %v1798_v48 = vmul.f32 %v2069_v50, %v1750_v0  ;;  %v1851_v25 = vadd.f32 %v2086_v16, %v1835_v52  ;;  %v1821_v33 = vmul.f32 %v3230_v40, %v1799_v27 }
 0x3d6   : > { %2072 = vrsqrt.f32 %v1760_v7  ;;  %v1736_v11 = vsub.f32 %v1704_v34, %v1720_v46  ;;  %v1769_v60 = vadd.f32 1e-05, %v1737_v35 }
 0x3d7   : > { %v1850_v36 = vadd.f32 %v2087_v21, %v1834_v62  ;;  %v1820_v57 = vmul.f32 %v3230_v40, %v1798_v48  ;;  %1867 = vst.msk [vmem:[%s3254_s18 + $0x28] sm:$0xff] %vm325_vm0, %v1851_v25  ;;  %v1843_v18 = vadd.f32 %v3239_v22, %v1821_v33 }
 0x3d8   : > { %v1768_v45 = vadd.f32 1e-05, %v1736_v11  ;;  %2074 = vrsqrt.f32 %v1769_v60 }
 0x3d9   : > { %1866 = vst.msk [vmem:[%s3254_s18 + $0x20] sm:$0xff] %vm325_vm0, %v1850_v36  ;;  %v1842_v24 = vadd.f32 %v3239_v22, %v1820_v57  ;;  %v1859_v41 = vadd.f32 %v2088_v30, %v1843_v18 }
 0x3da   : > { %2076 = vrsqrt.f32 %v1768_v45 }
 0x3db   : > { %v1858_v49 = vadd.f32 %v2089_v10, %v1842_v24  ;;  %1875 = vst.msk [vmem:[%s3254_s18 + $0x68] sm:$0xff] %vm325_vm0, %v1859_v41 }
 0x3dd   : > { %1874 = vst.msk [vmem:[%s3254_s18 + $0x60] sm:$0xff] %vm325_vm0, %v1858_v49 }
 0x3de   : > { %v2071_v26 = vpop.eup %2070 }
 0x3df   : > { %v1793_v1 = vmul.f32 %v2071_v26, %v1745_v12 }
 0x3e0   : > { %v2073_v58 = vpop.eup %2072 }
 0x3e1   : > { %v1792_v20 = vmul.f32 %v2073_v58, %v1744_v23  ;;  %v1815_v8 = vmul.f32 %v3230_v40, %v1793_v1 }
 0x3e2   : > { %v2075_v51 = vpop.eup %2074 }
 0x3e3   : > { %v1814_v56 = vmul.f32 %v3230_v40, %v1792_v20  ;;  %v1837_v39 = vadd.f32 %v3239_v22, %v1815_v8  ;;  %v1801_v44 = vmul.f32 %v2075_v51, %v1753_v37 }
 0x3e4   : > { %v2077_v38 = vpop.eup %2076 }
 0x3e5   : > { %v1836_v54 = vadd.f32 %v3239_v22, %v1814_v56  ;;  %v1800_v59 = vmul.f32 %v2077_v38, %v1752_v43  ;;  %v1853_v3 = vadd.f32 %v2090_v15, %v1837_v39  ;;  %v1823_v29 = vmul.f32 %v3230_v40, %v1801_v44 }
 0x3e7   : > { %v1852_v17 = vadd.f32 %v2091_v31, %v1836_v54  ;;  %v1822_v9 = vmul.f32 %v3230_v40, %v1800_v59  ;;  %1869 = vst.msk [vmem:[%s3254_s18 + $0x38] sm:$0xff] %vm325_vm0, %v1853_v3  ;;  %v1845_v63 = vadd.f32 %v3239_v22, %v1823_v29 }
 0x3e9   : > { %1868 = vst.msk [vmem:[%s3254_s18 + $0x30] sm:$0xff] %vm325_vm0, %v1852_v17  ;;  %v1844_v4 = vadd.f32 %v3239_v22, %v1822_v9  ;;  %v1861_v55 = vadd.f32 %v2092_v19, %v1845_v63 }
 0x3eb   : > { %v1860_v14 = vadd.f32 %v2093_v6, %v1844_v4  ;;  %1877 = vst.msk [vmem:[%s3254_s18 + $0x78] sm:$0xff] %vm325_vm0, %v1861_v55 }
 0x3ed   : > { %1876 = vst.msk [vmem:[%s3254_s18 + $0x70] sm:$0xff] %vm325_vm0, %v1860_v14 }
 0x3ee PF: > { %s18_s27 = sadd.s32 1, %s2100_s27  }
 0x3ef   : > { %p15_p4 = scmp.ge.s32.totalorder %s18_s27, 4  }
 0x3f1   :  { %17 = sbr.rel (!%p15_p4) target bundleno = 1 (0x1), region = 82 }

</bundles_post_ra>
